<compile_context>
chip_gen: v7x
topology: tpu7x:2x2x1
jax: 0.10.0
libtpu: 0.0.40
codegen_flags: <defaults>
</compile_context>

<pallas_src>
import numpy as np
import jax
import jax.numpy as jnp
from jax import lax
from jax.experimental import pallas as pl
from jax.experimental.pallas import tpu as pltpu

BELIEF_EMBEDDING_DIM = 32
_H = BELIEF_EMBEDDING_DIM


# --------------------------------------------------------------------------- #
# Host-side constant builders (run once at setup; nothing here is traced into
# the kernel).  Every spatial rearrangement is encoded in a small constant
# matrix so the kernel body is nothing but MXU matmuls + elementwise ops.
# --------------------------------------------------------------------------- #

def _conv_band(w_oihw, w_in):
    """Stride-1 VALID Conv2d as KH banded matrices.

    band[kh] has shape (w_in*IC, w_out*OC) with
      band[kh][wi*IC + ic, wo*OC + oc] = W[oc, ic, kh, wi - wo]  (0 <= wi-wo < KW)
    so that  out_slab = sum_kh  in_slab[kh:kh+h_out, :] @ band[kh].
    """
    w = np.asarray(w_oihw, np.float32)
    oc_n, ic_n, kh_n, kw_n = w.shape
    w_out = w_in - kw_n + 1
    band = np.zeros((kh_n, w_in * ic_n, w_out * oc_n), np.float32)
    for kh in range(kh_n):
        for wo in range(w_out):
            for kw in range(kw_n):
                wi = wo + kw
                band[kh, wi * ic_n:(wi + 1) * ic_n,
                     wo * oc_n:(wo + 1) * oc_n] = w[:, :, kh, kw].T  # (IC, OC)
    return band


def _deconv_band(w_iohw, w_in, stride, pad, extra):
    """ConvTranspose2d column handling folded into banded matrices.

    The ConvT is a direct conv (flipped kernel) over the zero-dilated + padded
    input.  The column dilation/padding scatter is folded host-side into the
    banded weights, so the kernel only sees the *undilated* column space.
    Returns (KH, w_in*IC, w_out*OC).
    """
    w = np.asarray(w_iohw, np.float32)
    ic_n, oc_n, kh_n, kw_n = w.shape
    # flipped direct-conv weight, OIHW
    w_dir = np.transpose(w[:, :, ::-1, ::-1], (1, 0, 2, 3))
    wp = (w_in - 1) * stride + 1 + 2 * pad + extra           # padded width
    band_p = _conv_band(w_dir, wp)                           # (KH, wp*IC, w_out*OC)
    scat = np.zeros((w_in * ic_n, wp * ic_n), np.float32)    # column scatter
    for wi in range(w_in):
        for c in range(ic_n):
            scat[wi * ic_n + c, (pad + stride * wi) * ic_n + c] = 1.0
    return np.einsum('ij,kjl->kil', scat, band_p)            # (KH, w_in*IC, w_out*OC)


def _row_dilate_mat(h_in, stride, pad, extra):
    """One-hot scatter matrix implementing row zero-dilation + padding."""
    hp = (h_in - 1) * stride + 1 + 2 * pad + extra
    d = np.zeros((hp, h_in), np.float32)
    for r in range(h_in):
        d[pad + stride * r, r] = 1.0
    return d


def _pool_row_sel(h_out):
    """(2, h_out, 2*h_out): even / odd row selectors for 2x2 max-pool."""
    s = np.zeros((2, h_out, 2 * h_out), np.float32)
    for r in range(h_out):
        s[0, r, 2 * r] = 1.0
        s[1, r, 2 * r + 1] = 1.0
    return s


def _pool_col_sel(w_out, c_n):
    """(2, 2*w_out*C, w_out*C): even / odd column-block selectors (per channel)."""
    t = np.zeros((2, 2 * w_out * c_n, w_out * c_n), np.float32)
    for w in range(w_out):
        for c in range(c_n):
            t[0, (2 * w) * c_n + c, w * c_n + c] = 1.0
            t[1, (2 * w + 1) * c_n + c, w * c_n + c] = 1.0
    return t


def _chw_to_hwc_index(c_n, h_n, w_n):
    """idx[h*W*C + w*C + c] = c*H*W + h*W + w  (torch CHW flatten order)."""
    idx = np.zeros((c_n * h_n * w_n,), np.int64)
    for h in range(h_n):
        for w in range(w_n):
            for c in range(c_n):
                idx[h * w_n * c_n + w * c_n + c] = c * h_n * w_n + h * w_n + w
    return idx


class _Packer:
    """Packs 2-D constants into one (rows, width) slab; blocks start on 8-aligned rows."""

    def __init__(self):
        self._blocks = []
        self._rows = 0
        self._width = 0

    def add(self, name, arr):
        arr = np.asarray(arr, np.float32)
        assert arr.ndim == 2
        self._blocks.append((name, self._rows, arr))
        self._rows += int(-(-arr.shape[0] // 8) * 8)
        self._width = max(self._width, arr.shape[1])

    def finalize(self):
        slab = np.zeros((self._rows, self._width), np.float32)
        layout = {}
        for name, r0, arr in self._blocks:
            nr, nc = arr.shape
            slab[r0:r0 + nr, 0:nc] = arr
            layout[name] = (r0, (nr, nc))
        return slab, layout


# --------------------------------------------------------------------------- #
# Parameters (torch layout) and kernel-ready packed constants
# --------------------------------------------------------------------------- #

def init_params(key):
    hd = BELIEF_EMBEDDING_DIM
    ks = jax.random.split(key, 16)

    def rnd(k, shape, scale=0.1):
        return scale * jax.random.normal(k, shape, dtype=jnp.float32)

    return {
        "conv1_w": rnd(ks[0], (8, 1, 3, 3)),  "conv1_b": rnd(ks[1], (8,)),
        "conv2_w": rnd(ks[2], (4, 8, 3, 3)),  "conv2_b": rnd(ks[3], (4,)),
        "w_ih": rnd(ks[4], (4 * hd, 144)),    "w_hh": rnd(ks[5], (4 * hd, hd)),
        "b_ih": rnd(ks[6], (4 * hd,)),        "b_hh": rnd(ks[7], (4 * hd,)),
        "fc_w": rnd(ks[8], (144, hd)),        "fc_b": rnd(ks[9], (144,)),
        "dec1_w": rnd(ks[10], (4, 8, 3, 3)),  "dec1_b": rnd(ks[11], (8,)),
        "dec2_w": rnd(ks[12], (8, 4, 3, 3)),  "dec2_b": rnd(ks[13], (4,)),
        "dec3_w": rnd(ks[14], (4, 1, 4, 4)),  "dec3_b": rnd(ks[15], (1,)),
    }


def build_packed_consts(params):
    """Builds the single packed constant slab + its static layout."""
    hd = BELIEF_EMBEDDING_DIM
    p = {k: np.asarray(v, np.float32) for k, v in params.items()}
    pk = _Packer()

    # ---- encoder conv1: fold the width max-pool selection into even/odd bands
    band1 = _conv_band(p["conv1_w"], 30)                      # (3, 30, 224), OC=8
    cols_e = np.array([(2 * j) * 8 + oc for j in range(14) for oc in range(8)])
    cols_o = np.array([(2 * j + 1) * 8 + oc for j in range(14) for oc in range(8)])
    for k in range(3):
        pk.add("w1e%d" % k, band1[k][:, cols_e])              # (30, 112)
        pk.add("w1o%d" % k, band1[k][:, cols_o])              # (30, 112)
    pk.add("b1", np.tile(p["conv1_b"], 14)[None, :])          # (1, 112)
    pr1 = _pool_row_sel(14)
    pk.add("pr1_0", pr1[0]); pk.add("pr1_1", pr1[1])          # (14, 28)

    # ---- encoder conv2 + 2x2 pool
    band2 = _conv_band(p["conv2_w"], 14)                      # (3, 112, 48)
    for k in range(3):
        pk.add("w2_%d" % k, band2[k])
    pk.add("b2", np.tile(p["conv2_b"], 6)[None, :])           # (1, 24)
    pr2 = _pool_row_sel(6)
    pc2 = _pool_col_sel(6, 4)
    pk.add("pr2_0", pr2[0]); pk.add("pr2_1", pr2[1])          # (6, 12)
    pk.add("pc2_0", pc2[0]); pk.add("pc2_1", pc2[1])          # (48, 24)

    # ---- LSTM (torch CHW flatten folded into wih row blocks)
    idx = _chw_to_hwc_index(4, 6, 6)                          # (144,)
    wih = p["w_ih"].T[idx, :].reshape(6, 24, 4 * hd)          # (6, 24, 128)
    for h in range(6):
        pk.add("wih%d" % h, wih[h])
    pk.add("whh", p["w_hh"].T)                                # (32, 128)
    pk.add("bl", (p["b_ih"] + p["b_hh"])[None, :])            # (1, 128)

    # ---- fc (flat, HWC order) + folded reshape/row-dilation for deconv1
    pk.add("fcw", p["fc_w"][idx, :].T)                        # (32, 144)
    pk.add("fcb", p["fc_b"][idx][None, :])                    # (1, 144)
    d1 = _row_dilate_mat(6, 2, 2, 1)                          # (16, 6)
    m6 = np.zeros((6, 144), np.float32)
    for h in range(6):
        m6[h, 24 * h:24 * (h + 1)] = 1.0
    pk.add("dm1", d1 @ m6)                                    # (16, 144) 0/1 mask
    wd1 = _deconv_band(p["dec1_w"], 6, 2, 2, 1)               # (3, 24, 112)
    for k in range(3):
        pk.add("wd1_%d" % k, np.tile(wd1[k], (6, 1)))         # (144, 112) row-tiled
    pk.add("bd1", np.tile(p["dec1_b"], 14)[None, :])          # (1, 112)

    # ---- deconv2: ConvT(8,4,3,s=2)
    pk.add("d2", _row_dilate_mat(14, 2, 2, 0))                # (31, 14)
    wd2 = _deconv_band(p["dec2_w"], 14, 2, 2, 0)              # (3, 112, 116)
    for k in range(3):
        pk.add("wd2_%d" % k, wd2[k])
    pk.add("bd2", np.tile(p["dec2_b"], 29)[None, :])          # (1, 116)

    # ---- deconv3: ConvT(4,1,4,s=1,p=1), N padded to 128 for lane-dense output
    pk.add("d3", _row_dilate_mat(29, 1, 2, 0))                # (33, 29)
    wd3 = _deconv_band(p["dec3_w"], 29, 1, 2, 0)              # (4, 116, 30)
    for k in range(4):
        wpad = np.zeros((116, 128), np.float32)
        wpad[:, :30] = wd3[k]
        pk.add("wd3_%d" % k, wpad)                            # (116, 128)
    bd3 = np.zeros((1, 128), np.float32)
    bd3[0, :30] = np.tile(p["dec3_b"], 30)
    pk.add("bd3", bd3)                                        # (1, 128)

    return pk.finalize()


# --------------------------------------------------------------------------- #
# The single fused Pallas kernel (constants carved from ONE packed VMEM slab)
# --------------------------------------------------------------------------- #

def make_kernel(layout):
    hd = BELIEF_EMBEDDING_DIM

    def kernel(x_ref, h0_ref, c0_ref, c_ref, out_ref):
        f32 = jnp.float32

        def blk(name):                      # static view into the packed constant slab
            r0, (nr, nc) = layout[name]
            return c_ref[r0:r0 + nr, 0:nc]

        def mm(a, b):
            return jnp.dot(a, b, preferred_element_type=f32)

        def sigmoid(z):                     # overflow-free, result exactly in [0, 1]
            return 0.5 * (jnp.tanh(0.5 * z) + 1.0)

        def banded_conv(src, names, h_out):
            # in-kernel "im2col": sum over KH taps of (static row slice) @ banded W
            acc = mm(src[0:h_out, :], blk(names[0]))
            for kh in range(1, len(names)):
                acc = acc + mm(src[kh:kh + h_out, :], blk(names[kh]))
            return acc

        # ------------------- conv encoder (conv + relu + pool, fused) ----------
        x = x_ref[...]                                               # (30, 30)
        # conv1: width-pool folded into even/odd banded weights
        y_e = banded_conv(x, ["w1e0", "w1e1", "w1e2"], 28)           # (28, 112)
        y_o = banded_conv(x, ["w1o0", "w1o1", "w1o2"], 28)           # (28, 112)
        cmax1 = jnp.maximum(y_e, y_o)                                # width-pooled
        rmax1 = jnp.maximum(mm(blk("pr1_0"), cmax1),
                            mm(blk("pr1_1"), cmax1))                 # (14, 112)
        p1 = jnp.maximum(rmax1 + blk("b1"), 0.0)

        e2 = banded_conv(p1, ["w2_0", "w2_1", "w2_2"], 12)           # (12, 48)
        rmax2 = jnp.maximum(mm(blk("pr2_0"), e2), mm(blk("pr2_1"), e2))        # (6, 48)
        cmax2 = jnp.maximum(mm(rmax2, blk("pc2_0")), mm(rmax2, blk("pc2_1")))  # (6, 24)
        p2 = jnp.maximum(cmax2 + blk("b2"), 0.0)

        # ------------------- LSTM step: gates in one lane-dense (1, 128) -------
        gates = mm(h0_ref[...], blk("whh")) + blk("bl")              # (1, 128)
        # TODO(synk): collapse into a single (1,144)@(144,128) matmul once the
        # (6,24)->(1,144) sublane->lane relayout is verified to lower in Mosaic;
        # kept as 6 tiny MXU matmuls for guaranteed lowering.
        for h in range(6):
            gates = gates + mm(p2[h:h + 1, :], blk("wih%d" % h))
        i_g = sigmoid(gates[:, 0 * hd:1 * hd])
        f_g = sigmoid(gates[:, 1 * hd:2 * hd])
        g_g = jnp.tanh(gates[:, 2 * hd:3 * hd])
        o_g = sigmoid(gates[:, 3 * hd:4 * hd])
        c_new = f_g * c0_ref[...] + i_g * g_g
        h_new = o_g * jnp.tanh(c_new)

        # ------------------- fc (single matmul) + folded reshape/dilation ------
        zflat = mm(h_new, blk("fcw")) + blk("fcb")                   # (1, 144)
        rd1 = jnp.broadcast_to(zflat, (16, 144)) * blk("dm1")        # (16, 144)
        u1 = jnp.maximum(
            banded_conv(rd1, ["wd1_0", "wd1_1", "wd1_2"], 14) + blk("bd1"), 0.0)   # (14, 112)

        rd2 = mm(blk("d2"), u1)                                      # (31, 112)
        u2 = jnp.maximum(
            banded_conv(rd2, ["wd2_0", "wd2_1", "wd2_2"], 29) + blk("bd2"), 0.0)   # (29, 116)

        rd3 = mm(blk("d3"), u2)                                      # (33, 116)
        u3 = banded_conv(rd3, ["wd3_0", "wd3_1", "wd3_2", "wd3_3"], 30) + blk("bd3")  # (30, 128)

        # ------------------- packed, lane-dense output --------------------------
        out_ref[0:30, :] = sigmoid(u3)            # image (lanes 0..29 valid), lane-dense
        out_ref[30:31, 0:hd] = h_new              # new hidden state
        out_ref[31:32, 0:hd] = c_new              # new cell state

    return kernel


# --------------------------------------------------------------------------- #
# Forward wrapper (single pallas_call; only trivial slicing glue outside)
# --------------------------------------------------------------------------- #

def make_forward(layout):
    kernel = make_kernel(layout)
    vmem = pl.BlockSpec(memory_space=pltpu.MemorySpace.VMEM)

    @jax.jit
    def forward(const_slab, x_nchw, lstm_h, lstm_c):
        hd = BELIEF_EMBEDDING_DIM
        x_slab = x_nchw[0, 0].astype(jnp.float32)                    # (30, 30), C=1
        h0 = lstm_h.reshape(1, hd).astype(jnp.float32)
        c0 = lstm_c.reshape(1, hd).astype(jnp.float32)

        res = pl.pallas_call(
            kernel,
            out_shape=jax.ShapeDtypeStruct((32, 128), jnp.float32),
            in_specs=[vmem, vmem, vmem, vmem],
            out_specs=vmem,
        )(x_slab, h0, c0, const_slab)

        out = res[0:30, 0:30][None, None]                            # (1, 1, 30, 30)
        h1 = res[30:31, 0:hd]                                        # (1, hd)
        c1 = res[31:32, 0:hd]                                        # (1, hd)
        policy_feature = h1
        return out, h1.reshape(1, 1, hd), c1.reshape(1, 1, hd), policy_feature

    return forward


# --------------------------------------------------------------------------- #
# Pure-XLA reference of the PyTorch module (for the in-script cross-check)
# --------------------------------------------------------------------------- #

def reference_forward(params, x_nchw, lstm_h, lstm_c):
    hd = BELIEF_EMBEDDING_DIM
    hi = lax.Precision.HIGHEST
    dn = ("NCHW", "OIHW", "NCHW")

    def conv(x, w, b, pad, lhs_dil):
        y = lax.conv_general_dilated(x, w, (1, 1), pad, lhs_dilation=lhs_dil,
                                     dimension_numbers=dn, precision=hi)
        return y + b[None, :, None, None]

    def tconv(x, w_t, b, stride, pad_lo, pad_hi):
        w_dir = jnp.transpose(w_t[:, :, ::-1, ::-1], (1, 0, 2, 3))
        return conv(x, w_dir, b, [(pad_lo, pad_hi)] * 2, (stride, stride))

    def pool(x):
        return lax.reduce_window(x, jnp.array(-jnp.inf, x.dtype), lax.max,
                                 (1, 1, 2, 2), (1, 1, 2, 2), "VALID")

    x = jnp.maximum(conv(x_nchw, params["conv1_w"], params["conv1_b"],
                         "VALID", (1, 1)), 0.0)
    x = pool(x)
    x = jnp.maximum(conv(x, params["conv2_w"], params["conv2_b"],
                         "VALID", (1, 1)), 0.0)
    x = pool(x)                                                  # (1, 4, 6, 6)
    feat = x.reshape(1, -1)                                      # CHW flatten

    h0 = lstm_h.reshape(1, hd)
    c0 = lstm_c.reshape(1, hd)
    gates = (jnp.dot(feat, params["w_ih"].T, precision=hi) + params["b_ih"]
             + jnp.dot(h0, params["w_hh"].T, precision=hi) + params["b_hh"])
    i_g = jax.nn.sigmoid(gates[:, 0 * hd:1 * hd])
    f_g = jax.nn.sigmoid(gates[:, 1 * hd:2 * hd])
    g_g = jnp.tanh(gates[:, 2 * hd:3 * hd])
    o_g = jax.nn.sigmoid(gates[:, 3 * hd:4 * hd])
    c1 = f_g * c0 + i_g * g_g
    h1 = o_g * jnp.tanh(c1)

    z = jnp.dot(h1, params["fc_w"].T, precision=hi) + params["fc_b"]
    z = z.reshape(1, 4, 6, 6)

    d = jnp.maximum(tconv(z, params["dec1_w"], params["dec1_b"], 2, 2, 3), 0.0)
    d = jnp.maximum(tconv(d, params["dec2_w"], params["dec2_b"], 2, 2, 2), 0.0)
    d = jax.nn.sigmoid(tconv(d, params["dec3_w"], params["dec3_b"], 1, 2, 2))
    return d, h1.reshape(1, 1, hd), c1.reshape(1, 1, hd), h1


# --------------------------------------------------------------------------- #
# Main
# --------------------------------------------------------------------------- #

if __name__ == "__main__":
    key = jax.random.PRNGKey(0)
    pkey, xkey = jax.random.split(key)
    params = init_params(pkey)

    slab_np, layout = build_packed_consts(params)
    const_slab = jnp.asarray(slab_np)                            # one packed DMA
    forward = make_forward(layout)

    x = jax.random.normal(xkey, (1, 1, 30, 30), dtype=jnp.float32)
    lstm_h = jnp.zeros((1, 1, BELIEF_EMBEDDING_DIM), jnp.float32)
    lstm_c = jnp.zeros((1, 1, BELIEF_EMBEDDING_DIM), jnp.float32)

    out, h, c, feat = forward(const_slab, x, lstm_h, lstm_c)
    jax.block_until_ready((out, h, c, feat))

    assert out.shape == (1, 1, 30, 30)
    assert h.shape == (1, 1, BELIEF_EMBEDDING_DIM)
    assert c.shape == (1, 1, BELIEF_EMBEDDING_DIM)
    assert feat.shape == (1, BELIEF_EMBEDDING_DIM)
    assert bool(jnp.all((out >= 0.0) & (out <= 1.0)))            # sigmoid range

    # Cross-check the fused kernel against a pure-XLA reference of the module.
    # Tolerance is loose because the Pallas MXU matmuls and the XLA reference
    # may use different f32 matmul decompositions on TPU.
    r_out, r_h, r_c, _ = reference_forward(params, x, lstm_h, lstm_c)
    tol = 2e-2
    assert float(jnp.max(jnp.abs(out - r_out))) < tol
    assert float(jnp.max(jnp.abs(h - r_h))) < tol
    assert float(jnp.max(jnp.abs(c - r_c))) < tol

    print("KERNEL_OK")
</pallas_src>

<mosaic_0001>
module attributes {stable_mosaic.version = 11 : i64} {
  func.func @kernel(%arg0: memref<30x30xf32, #tpu.memory_space<vmem>>, %arg1: memref<1x32xf32, #tpu.memory_space<vmem>>, %arg2: memref<1x32xf32, #tpu.memory_space<vmem>>, %arg3: memref<2272x144xf32, #tpu.memory_space<vmem>>, %arg4: memref<32x128xf32, #tpu.memory_space<vmem>>) attributes {dimension_semantics = [], scalar_prefetch = 0 : i64, scratch_operands = 0 : i64, tpu.core_type = #tpu.core_type<tc>} {
    %c0 = arith.constant 0 : index
    %c0_0 = arith.constant 0 : index
    %0 = vector.load %arg0[%c0, %c0_0] : memref<30x30xf32, #tpu.memory_space<vmem>>, vector<30x30xf32>
    %1 = vector.extract_strided_slice %0 {offsets = [0, 0], sizes = [28, 30], strides = [1, 1]} : vector<30x30xf32> to vector<28x30xf32>
    %c0_1 = arith.constant 0 : index
    %c0_2 = arith.constant 0 : index
    %2 = vector.load %arg3[%c0_1, %c0_2] : memref<2272x144xf32, #tpu.memory_space<vmem>>, vector<30x112xf32>
    %cst = arith.constant dense<0.000000e+00> : vector<28x112xf32>
    %3 = tpu.matmul %1, %2, %cst {dimension_numbers = #tpu.dot_dimension_numbers<[1], [0], [0], [1], [0, 0, 1, 1], [], []>} : vector<28x30xf32>, vector<30x112xf32>, vector<28x112xf32> -> vector<28x112xf32>
    %4 = vector.extract_strided_slice %0 {offsets = [1, 0], sizes = [28, 30], strides = [1, 1]} : vector<30x30xf32> to vector<28x30xf32>
    %c64 = arith.constant 64 : index
    %c0_3 = arith.constant 0 : index
    %5 = vector.load %arg3[%c64, %c0_3] : memref<2272x144xf32, #tpu.memory_space<vmem>>, vector<30x112xf32>
    %cst_4 = arith.constant dense<0.000000e+00> : vector<28x112xf32>
    %6 = tpu.matmul %4, %5, %cst_4 {dimension_numbers = #tpu.dot_dimension_numbers<[1], [0], [0], [1], [0, 0, 1, 1], [], []>} : vector<28x30xf32>, vector<30x112xf32>, vector<28x112xf32> -> vector<28x112xf32>
    %7 = arith.addf %3, %6 : vector<28x112xf32>
    %8 = vector.extract_strided_slice %0 {offsets = [2, 0], sizes = [28, 30], strides = [1, 1]} : vector<30x30xf32> to vector<28x30xf32>
    %c128 = arith.constant 128 : index
    %c0_5 = arith.constant 0 : index
    %9 = vector.load %arg3[%c128, %c0_5] : memref<2272x144xf32, #tpu.memory_space<vmem>>, vector<30x112xf32>
    %cst_6 = arith.constant dense<0.000000e+00> : vector<28x112xf32>
    %10 = tpu.matmul %8, %9, %cst_6 {dimension_numbers = #tpu.dot_dimension_numbers<[1], [0], [0], [1], [0, 0, 1, 1], [], []>} : vector<28x30xf32>, vector<30x112xf32>, vector<28x112xf32> -> vector<28x112xf32>
    %11 = arith.addf %7, %10 : vector<28x112xf32>
    %12 = vector.extract_strided_slice %0 {offsets = [0, 0], sizes = [28, 30], strides = [1, 1]} : vector<30x30xf32> to vector<28x30xf32>
    %c32 = arith.constant 32 : index
    %c0_7 = arith.constant 0 : index
    %13 = vector.load %arg3[%c32, %c0_7] : memref<2272x144xf32, #tpu.memory_space<vmem>>, vector<30x112xf32>
    %cst_8 = arith.constant dense<0.000000e+00> : vector<28x112xf32>
    %14 = tpu.matmul %12, %13, %cst_8 {dimension_numbers = #tpu.dot_dimension_numbers<[1], [0], [0], [1], [0, 0, 1, 1], [], []>} : vector<28x30xf32>, vector<30x112xf32>, vector<28x112xf32> -> vector<28x112xf32>
    %15 = vector.extract_strided_slice %0 {offsets = [1, 0], sizes = [28, 30], strides = [1, 1]} : vector<30x30xf32> to vector<28x30xf32>
    %c96 = arith.constant 96 : index
    %c0_9 = arith.constant 0 : index
    %16 = vector.load %arg3[%c96, %c0_9] : memref<2272x144xf32, #tpu.memory_space<vmem>>, vector<30x112xf32>
    %cst_10 = arith.constant dense<0.000000e+00> : vector<28x112xf32>
    %17 = tpu.matmul %15, %16, %cst_10 {dimension_numbers = #tpu.dot_dimension_numbers<[1], [0], [0], [1], [0, 0, 1, 1], [], []>} : vector<28x30xf32>, vector<30x112xf32>, vector<28x112xf32> -> vector<28x112xf32>
    %18 = arith.addf %14, %17 : vector<28x112xf32>
    %19 = vector.extract_strided_slice %0 {offsets = [2, 0], sizes = [28, 30], strides = [1, 1]} : vector<30x30xf32> to vector<28x30xf32>
    %c160 = arith.constant 160 : index
    %c0_11 = arith.constant 0 : index
    %20 = vector.load %arg3[%c160, %c0_11] : memref<2272x144xf32, #tpu.memory_space<vmem>>, vector<30x112xf32>
    %cst_12 = arith.constant dense<0.000000e+00> : vector<28x112xf32>
    %21 = tpu.matmul %19, %20, %cst_12 {dimension_numbers = #tpu.dot_dimension_numbers<[1], [0], [0], [1], [0, 0, 1, 1], [], []>} : vector<28x30xf32>, vector<30x112xf32>, vector<28x112xf32> -> vector<28x112xf32>
    %22 = arith.addf %18, %21 : vector<28x112xf32>
    %23 = arith.maximumf %11, %22 : vector<28x112xf32>
    %c200 = arith.constant 200 : index
    %c0_13 = arith.constant 0 : index
    %24 = vector.load %arg3[%c200, %c0_13] : memref<2272x144xf32, #tpu.memory_space<vmem>>, vector<14x28xf32>
    %cst_14 = arith.constant dense<0.000000e+00> : vector<14x112xf32>
    %25 = tpu.matmul %24, %23, %cst_14 {dimension_numbers = #tpu.dot_dimension_numbers<[1], [0], [0], [1], [0, 0, 1, 1], [], []>} : vector<14x28xf32>, vector<28x112xf32>, vector<14x112xf32> -> vector<14x112xf32>
    %c216 = arith.constant 216 : index
    %c0_15 = arith.constant 0 : index
    %26 = vector.load %arg3[%c216, %c0_15] : memref<2272x144xf32, #tpu.memory_space<vmem>>, vector<14x28xf32>
    %cst_16 = arith.constant dense<0.000000e+00> : vector<14x112xf32>
    %27 = tpu.matmul %26, %23, %cst_16 {dimension_numbers = #tpu.dot_dimension_numbers<[1], [0], [0], [1], [0, 0, 1, 1], [], []>} : vector<14x28xf32>, vector<28x112xf32>, vector<14x112xf32> -> vector<14x112xf32>
    %28 = arith.maximumf %25, %27 : vector<14x112xf32>
    %c192 = arith.constant 192 : index
    %c0_17 = arith.constant 0 : index
    %29 = vector.load %arg3[%c192, %c0_17] : memref<2272x144xf32, #tpu.memory_space<vmem>>, vector<1x112xf32>
    %30 = vector.broadcast %29 : vector<1x112xf32> to vector<14x112xf32>
    %31 = arith.addf %28, %30 : vector<14x112xf32>
    %cst_18 = arith.constant 0.000000e+00 : f32
    %32 = vector.broadcast %cst_18 : f32 to vector<14x112xf32>
    %33 = arith.maximumf %31, %32 : vector<14x112xf32>
    %34 = vector.extract_strided_slice %33 {offsets = [0, 0], sizes = [12, 112], strides = [1, 1]} : vector<14x112xf32> to vector<12x112xf32>
    %c232 = arith.constant 232 : index
    %c0_19 = arith.constant 0 : index
    %35 = vector.load %arg3[%c232, %c0_19] : memref<2272x144xf32, #tpu.memory_space<vmem>>, vector<112x48xf32>
    %cst_20 = arith.constant dense<0.000000e+00> : vector<12x48xf32>
    %36 = tpu.matmul %34, %35, %cst_20 {dimension_numbers = #tpu.dot_dimension_numbers<[1], [0], [0], [1], [0, 0, 1, 1], [], []>} : vector<12x112xf32>, vector<112x48xf32>, vector<12x48xf32> -> vector<12x48xf32>
    %37 = vector.extract_strided_slice %33 {offsets = [1, 0], sizes = [12, 112], strides = [1, 1]} : vector<14x112xf32> to vector<12x112xf32>
    %c344 = arith.constant 344 : index
    %c0_21 = arith.constant 0 : index
    %38 = vector.load %arg3[%c344, %c0_21] : memref<2272x144xf32, #tpu.memory_space<vmem>>, vector<112x48xf32>
    %cst_22 = arith.constant dense<0.000000e+00> : vector<12x48xf32>
    %39 = tpu.matmul %37, %38, %cst_22 {dimension_numbers = #tpu.dot_dimension_numbers<[1], [0], [0], [1], [0, 0, 1, 1], [], []>} : vector<12x112xf32>, vector<112x48xf32>, vector<12x48xf32> -> vector<12x48xf32>
    %40 = arith.addf %36, %39 : vector<12x48xf32>
    %41 = vector.extract_strided_slice %33 {offsets = [2, 0], sizes = [12, 112], strides = [1, 1]} : vector<14x112xf32> to vector<12x112xf32>
    %c456 = arith.constant 456 : index
    %c0_23 = arith.constant 0 : index
    %42 = vector.load %arg3[%c456, %c0_23] : memref<2272x144xf32, #tpu.memory_space<vmem>>, vector<112x48xf32>
    %cst_24 = arith.constant dense<0.000000e+00> : vector<12x48xf32>
    %43 = tpu.matmul %41, %42, %cst_24 {dimension_numbers = #tpu.dot_dimension_numbers<[1], [0], [0], [1], [0, 0, 1, 1], [], []>} : vector<12x112xf32>, vector<112x48xf32>, vector<12x48xf32> -> vector<12x48xf32>
    %44 = arith.addf %40, %43 : vector<12x48xf32>
    %c576 = arith.constant 576 : index
    %c0_25 = arith.constant 0 : index
    %45 = vector.load %arg3[%c576, %c0_25] : memref<2272x144xf32, #tpu.memory_space<vmem>>, vector<6x12xf32>
    %cst_26 = arith.constant dense<0.000000e+00> : vector<6x48xf32>
    %46 = tpu.matmul %45, %44, %cst_26 {dimension_numbers = #tpu.dot_dimension_numbers<[1], [0], [0], [1], [0, 0, 1, 1], [], []>} : vector<6x12xf32>, vector<12x48xf32>, vector<6x48xf32> -> vector<6x48xf32>
    %c584 = arith.constant 584 : index
    %c0_27 = arith.constant 0 : index
    %47 = vector.load %arg3[%c584, %c0_27] : memref<2272x144xf32, #tpu.memory_space<vmem>>, vector<6x12xf32>
    %cst_28 = arith.constant dense<0.000000e+00> : vector<6x48xf32>
    %48 = tpu.matmul %47, %44, %cst_28 {dimension_numbers = #tpu.dot_dimension_numbers<[1], [0], [0], [1], [0, 0, 1, 1], [], []>} : vector<6x12xf32>, vector<12x48xf32>, vector<6x48xf32> -> vector<6x48xf32>
    %49 = arith.maximumf %46, %48 : vector<6x48xf32>
    %c592 = arith.constant 592 : index
    %c0_29 = arith.constant 0 : index
    %50 = vector.load %arg3[%c592, %c0_29] : memref<2272x144xf32, #tpu.memory_space<vmem>>, vector<48x24xf32>
    %cst_30 = arith.constant dense<0.000000e+00> : vector<6x24xf32>
    %51 = tpu.matmul %49, %50, %cst_30 {dimension_numbers = #tpu.dot_dimension_numbers<[1], [0], [0], [1], [0, 0, 1, 1], [], []>} : vector<6x48xf32>, vector<48x24xf32>, vector<6x24xf32> -> vector<6x24xf32>
    %c640 = arith.constant 640 : index
    %c0_31 = arith.constant 0 : index
    %52 = vector.load %arg3[%c640, %c0_31] : memref<2272x144xf32, #tpu.memory_space<vmem>>, vector<48x24xf32>
    %cst_32 = arith.constant dense<0.000000e+00> : vector<6x24xf32>
    %53 = tpu.matmul %49, %52, %cst_32 {dimension_numbers = #tpu.dot_dimension_numbers<[1], [0], [0], [1], [0, 0, 1, 1], [], []>} : vector<6x48xf32>, vector<48x24xf32>, vector<6x24xf32> -> vector<6x24xf32>
    %54 = arith.maximumf %51, %53 : vector<6x24xf32>
    %c568 = arith.constant 568 : index
    %c0_33 = arith.constant 0 : index
    %55 = vector.load %arg3[%c568, %c0_33] : memref<2272x144xf32, #tpu.memory_space<vmem>>, vector<1x24xf32>
    %56 = vector.broadcast %55 : vector<1x24xf32> to vector<6x24xf32>
    %57 = arith.addf %54, %56 : vector<6x24xf32>
    %cst_34 = arith.constant 0.000000e+00 : f32
    %58 = vector.broadcast %cst_34 : f32 to vector<6x24xf32>
    %59 = arith.maximumf %57, %58 : vector<6x24xf32>
    %c0_35 = arith.constant 0 : index
    %c0_36 = arith.constant 0 : index
    %60 = vector.load %arg1[%c0_35, %c0_36] : memref<1x32xf32, #tpu.memory_space<vmem>>, vector<1x32xf32>
    %c832 = arith.constant 832 : index
    %c0_37 = arith.constant 0 : index
    %61 = vector.load %arg3[%c832, %c0_37] : memref<2272x144xf32, #tpu.memory_space<vmem>>, vector<32x128xf32>
    %cst_38 = arith.constant dense<0.000000e+00> : vector<1x128xf32>
    %62 = tpu.matmul %60, %61, %cst_38 {dimension_numbers = #tpu.dot_dimension_numbers<[1], [0], [0], [1], [0, 0, 1, 1], [], []>} : vector<1x32xf32>, vector<32x128xf32>, vector<1x128xf32> -> vector<1x128xf32>
    %c864 = arith.constant 864 : index
    %c0_39 = arith.constant 0 : index
    %63 = vector.load %arg3[%c864, %c0_39] : memref<2272x144xf32, #tpu.memory_space<vmem>>, vector<1x128xf32>
    %64 = arith.addf %62, %63 : vector<1x128xf32>
    %65 = vector.extract_strided_slice %59 {offsets = [0, 0], sizes = [1, 24], strides = [1, 1]} : vector<6x24xf32> to vector<1x24xf32>
    %c688 = arith.constant 688 : index
    %c0_40 = arith.constant 0 : index
    %66 = vector.load %arg3[%c688, %c0_40] : memref<2272x144xf32, #tpu.memory_space<vmem>>, vector<24x128xf32>
    %cst_41 = arith.constant dense<0.000000e+00> : vector<1x128xf32>
    %67 = tpu.matmul %65, %66, %cst_41 {dimension_numbers = #tpu.dot_dimension_numbers<[1], [0], [0], [1], [0, 0, 1, 1], [], []>} : vector<1x24xf32>, vector<24x128xf32>, vector<1x128xf32> -> vector<1x128xf32>
    %68 = arith.addf %64, %67 : vector<1x128xf32>
    %69 = vector.extract_strided_slice %59 {offsets = [1, 0], sizes = [1, 24], strides = [1, 1]} : vector<6x24xf32> to vector<1x24xf32>
    %c712 = arith.constant 712 : index
    %c0_42 = arith.constant 0 : index
    %70 = vector.load %arg3[%c712, %c0_42] : memref<2272x144xf32, #tpu.memory_space<vmem>>, vector<24x128xf32>
    %cst_43 = arith.constant dense<0.000000e+00> : vector<1x128xf32>
    %71 = tpu.matmul %69, %70, %cst_43 {dimension_numbers = #tpu.dot_dimension_numbers<[1], [0], [0], [1], [0, 0, 1, 1], [], []>} : vector<1x24xf32>, vector<24x128xf32>, vector<1x128xf32> -> vector<1x128xf32>
    %72 = arith.addf %68, %71 : vector<1x128xf32>
    %73 = vector.extract_strided_slice %59 {offsets = [2, 0], sizes = [1, 24], strides = [1, 1]} : vector<6x24xf32> to vector<1x24xf32>
    %c736 = arith.constant 736 : index
    %c0_44 = arith.constant 0 : index
    %74 = vector.load %arg3[%c736, %c0_44] : memref<2272x144xf32, #tpu.memory_space<vmem>>, vector<24x128xf32>
    %cst_45 = arith.constant dense<0.000000e+00> : vector<1x128xf32>
    %75 = tpu.matmul %73, %74, %cst_45 {dimension_numbers = #tpu.dot_dimension_numbers<[1], [0], [0], [1], [0, 0, 1, 1], [], []>} : vector<1x24xf32>, vector<24x128xf32>, vector<1x128xf32> -> vector<1x128xf32>
    %76 = arith.addf %72, %75 : vector<1x128xf32>
    %77 = vector.extract_strided_slice %59 {offsets = [3, 0], sizes = [1, 24], strides = [1, 1]} : vector<6x24xf32> to vector<1x24xf32>
    %c760 = arith.constant 760 : index
    %c0_46 = arith.constant 0 : index
    %78 = vector.load %arg3[%c760, %c0_46] : memref<2272x144xf32, #tpu.memory_space<vmem>>, vector<24x128xf32>
    %cst_47 = arith.constant dense<0.000000e+00> : vector<1x128xf32>
    %79 = tpu.matmul %77, %78, %cst_47 {dimension_numbers = #tpu.dot_dimension_numbers<[1], [0], [0], [1], [0, 0, 1, 1], [], []>} : vector<1x24xf32>, vector<24x128xf32>, vector<1x128xf32> -> vector<1x128xf32>
    %80 = arith.addf %76, %79 : vector<1x128xf32>
    %81 = vector.extract_strided_slice %59 {offsets = [4, 0], sizes = [1, 24], strides = [1, 1]} : vector<6x24xf32> to vector<1x24xf32>
    %c784 = arith.constant 784 : index
    %c0_48 = arith.constant 0 : index
    %82 = vector.load %arg3[%c784, %c0_48] : memref<2272x144xf32, #tpu.memory_space<vmem>>, vector<24x128xf32>
    %cst_49 = arith.constant dense<0.000000e+00> : vector<1x128xf32>
    %83 = tpu.matmul %81, %82, %cst_49 {dimension_numbers = #tpu.dot_dimension_numbers<[1], [0], [0], [1], [0, 0, 1, 1], [], []>} : vector<1x24xf32>, vector<24x128xf32>, vector<1x128xf32> -> vector<1x128xf32>
    %84 = arith.addf %80, %83 : vector<1x128xf32>
    %85 = vector.extract_strided_slice %59 {offsets = [5, 0], sizes = [1, 24], strides = [1, 1]} : vector<6x24xf32> to vector<1x24xf32>
    %c808 = arith.constant 808 : index
    %c0_50 = arith.constant 0 : index
    %86 = vector.load %arg3[%c808, %c0_50] : memref<2272x144xf32, #tpu.memory_space<vmem>>, vector<24x128xf32>
    %cst_51 = arith.constant dense<0.000000e+00> : vector<1x128xf32>
    %87 = tpu.matmul %85, %86, %cst_51 {dimension_numbers = #tpu.dot_dimension_numbers<[1], [0], [0], [1], [0, 0, 1, 1], [], []>} : vector<1x24xf32>, vector<24x128xf32>, vector<1x128xf32> -> vector<1x128xf32>
    %88 = arith.addf %84, %87 : vector<1x128xf32>
    %89 = vector.extract_strided_slice %88 {offsets = [0, 0], sizes = [1, 32], strides = [1, 1]} : vector<1x128xf32> to vector<1x32xf32>
    %cst_52 = arith.constant 5.000000e-01 : f32
    %90 = vector.broadcast %cst_52 : f32 to vector<1x32xf32>
    %91 = arith.mulf %90, %89 : vector<1x32xf32>
    %92 = math.tanh %91 : vector<1x32xf32>
    %cst_53 = arith.constant 1.000000e+00 : f32
    %93 = vector.broadcast %cst_53 : f32 to vector<1x32xf32>
    %94 = arith.addf %92, %93 : vector<1x32xf32>
    %cst_54 = arith.constant 5.000000e-01 : f32
    %95 = vector.broadcast %cst_54 : f32 to vector<1x32xf32>
    %96 = arith.mulf %95, %94 : vector<1x32xf32>
    %97 = vector.extract_strided_slice %88 {offsets = [0, 32], sizes = [1, 32], strides = [1, 1]} : vector<1x128xf32> to vector<1x32xf32>
    %cst_55 = arith.constant 5.000000e-01 : f32
    %98 = vector.broadcast %cst_55 : f32 to vector<1x32xf32>
    %99 = arith.mulf %98, %97 : vector<1x32xf32>
    %100 = math.tanh %99 : vector<1x32xf32>
    %cst_56 = arith.constant 1.000000e+00 : f32
    %101 = vector.broadcast %cst_56 : f32 to vector<1x32xf32>
    %102 = arith.addf %100, %101 : vector<1x32xf32>
    %cst_57 = arith.constant 5.000000e-01 : f32
    %103 = vector.broadcast %cst_57 : f32 to vector<1x32xf32>
    %104 = arith.mulf %103, %102 : vector<1x32xf32>
    %105 = vector.extract_strided_slice %88 {offsets = [0, 64], sizes = [1, 32], strides = [1, 1]} : vector<1x128xf32> to vector<1x32xf32>
    %106 = math.tanh %105 : vector<1x32xf32>
    %107 = vector.extract_strided_slice %88 {offsets = [0, 96], sizes = [1, 32], strides = [1, 1]} : vector<1x128xf32> to vector<1x32xf32>
    %cst_58 = arith.constant 5.000000e-01 : f32
    %108 = vector.broadcast %cst_58 : f32 to vector<1x32xf32>
    %109 = arith.mulf %108, %107 : vector<1x32xf32>
    %110 = math.tanh %109 : vector<1x32xf32>
    %cst_59 = arith.constant 1.000000e+00 : f32
    %111 = vector.broadcast %cst_59 : f32 to vector<1x32xf32>
    %112 = arith.addf %110, %111 : vector<1x32xf32>
    %cst_60 = arith.constant 5.000000e-01 : f32
    %113 = vector.broadcast %cst_60 : f32 to vector<1x32xf32>
    %114 = arith.mulf %113, %112 : vector<1x32xf32>
    %c0_61 = arith.constant 0 : index
    %c0_62 = arith.constant 0 : index
    %115 = vector.load %arg2[%c0_61, %c0_62] : memref<1x32xf32, #tpu.memory_space<vmem>>, vector<1x32xf32>
    %116 = arith.mulf %104, %115 : vector<1x32xf32>
    %117 = arith.mulf %96, %106 : vector<1x32xf32>
    %118 = arith.addf %116, %117 : vector<1x32xf32>
    %119 = math.tanh %118 : vector<1x32xf32>
    %120 = arith.mulf %114, %119 : vector<1x32xf32>
    %c872 = arith.constant 872 : index
    %c0_63 = arith.constant 0 : index
    %121 = vector.load %arg3[%c872, %c0_63] : memref<2272x144xf32, #tpu.memory_space<vmem>>, vector<32x144xf32>
    %cst_64 = arith.constant dense<0.000000e+00> : vector<1x144xf32>
    %122 = tpu.matmul %120, %121, %cst_64 {dimension_numbers = #tpu.dot_dimension_numbers<[1], [0], [0], [1], [0, 0, 1, 1], [], []>} : vector<1x32xf32>, vector<32x144xf32>, vector<1x144xf32> -> vector<1x144xf32>
    %c904 = arith.constant 904 : index
    %c0_65 = arith.constant 0 : index
    %123 = vector.load %arg3[%c904, %c0_65] : memref<2272x144xf32, #tpu.memory_space<vmem>>, vector<1x144xf32>
    %124 = arith.addf %122, %123 : vector<1x144xf32>
    %125 = vector.shape_cast %124 : vector<1x144xf32> to vector<1x144xf32>
    %126 = vector.broadcast %125 : vector<1x144xf32> to vector<16x144xf32>
    %c912 = arith.constant 912 : index
    %c0_66 = arith.constant 0 : index
    %127 = vector.load %arg3[%c912, %c0_66] : memref<2272x144xf32, #tpu.memory_space<vmem>>, vector<16x144xf32>
    %128 = arith.mulf %126, %127 : vector<16x144xf32>
    %129 = vector.extract_strided_slice %128 {offsets = [0, 0], sizes = [14, 144], strides = [1, 1]} : vector<16x144xf32> to vector<14x144xf32>
    %c928 = arith.constant 928 : index
    %c0_67 = arith.constant 0 : index
    %130 = vector.load %arg3[%c928, %c0_67] : memref<2272x144xf32, #tpu.memory_space<vmem>>, vector<144x112xf32>
    %cst_68 = arith.constant dense<0.000000e+00> : vector<14x112xf32>
    %131 = tpu.matmul %129, %130, %cst_68 {dimension_numbers = #tpu.dot_dimension_numbers<[1], [0], [0], [1], [0, 0, 1, 1], [], []>} : vector<14x144xf32>, vector<144x112xf32>, vector<14x112xf32> -> vector<14x112xf32>
    %132 = vector.extract_strided_slice %128 {offsets = [1, 0], sizes = [14, 144], strides = [1, 1]} : vector<16x144xf32> to vector<14x144xf32>
    %c1072 = arith.constant 1072 : index
    %c0_69 = arith.constant 0 : index
    %133 = vector.load %arg3[%c1072, %c0_69] : memref<2272x144xf32, #tpu.memory_space<vmem>>, vector<144x112xf32>
    %cst_70 = arith.constant dense<0.000000e+00> : vector<14x112xf32>
    %134 = tpu.matmul %132, %133, %cst_70 {dimension_numbers = #tpu.dot_dimension_numbers<[1], [0], [0], [1], [0, 0, 1, 1], [], []>} : vector<14x144xf32>, vector<144x112xf32>, vector<14x112xf32> -> vector<14x112xf32>
    %135 = arith.addf %131, %134 : vector<14x112xf32>
    %136 = vector.extract_strided_slice %128 {offsets = [2, 0], sizes = [14, 144], strides = [1, 1]} : vector<16x144xf32> to vector<14x144xf32>
    %c1216 = arith.constant 1216 : index
    %c0_71 = arith.constant 0 : index
    %137 = vector.load %arg3[%c1216, %c0_71] : memref<2272x144xf32, #tpu.memory_space<vmem>>, vector<144x112xf32>
    %cst_72 = arith.constant dense<0.000000e+00> : vector<14x112xf32>
    %138 = tpu.matmul %136, %137, %cst_72 {dimension_numbers = #tpu.dot_dimension_numbers<[1], [0], [0], [1], [0, 0, 1, 1], [], []>} : vector<14x144xf32>, vector<144x112xf32>, vector<14x112xf32> -> vector<14x112xf32>
    %139 = arith.addf %135, %138 : vector<14x112xf32>
    %c1360 = arith.constant 1360 : index
    %c0_73 = arith.constant 0 : index
    %140 = vector.load %arg3[%c1360, %c0_73] : memref<2272x144xf32, #tpu.memory_space<vmem>>, vector<1x112xf32>
    %141 = vector.broadcast %140 : vector<1x112xf32> to vector<14x112xf32>
    %142 = arith.addf %139, %141 : vector<14x112xf32>
    %cst_74 = arith.constant 0.000000e+00 : f32
    %143 = vector.broadcast %cst_74 : f32 to vector<14x112xf32>
    %144 = arith.maximumf %142, %143 : vector<14x112xf32>
    %c1368 = arith.constant 1368 : index
    %c0_75 = arith.constant 0 : index
    %145 = vector.load %arg3[%c1368, %c0_75] : memref<2272x144xf32, #tpu.memory_space<vmem>>, vector<31x14xf32>
    %cst_76 = arith.constant dense<0.000000e+00> : vector<31x112xf32>
    %146 = tpu.matmul %145, %144, %cst_76 {dimension_numbers = #tpu.dot_dimension_numbers<[1], [0], [0], [1], [0, 0, 1, 1], [], []>} : vector<31x14xf32>, vector<14x112xf32>, vector<31x112xf32> -> vector<31x112xf32>
    %147 = vector.extract_strided_slice %146 {offsets = [0, 0], sizes = [29, 112], strides = [1, 1]} : vector<31x112xf32> to vector<29x112xf32>
    %c1400 = arith.constant 1400 : index
    %c0_77 = arith.constant 0 : index
    %148 = vector.load %arg3[%c1400, %c0_77] : memref<2272x144xf32, #tpu.memory_space<vmem>>, vector<112x116xf32>
    %cst_78 = arith.constant dense<0.000000e+00> : vector<29x116xf32>
    %149 = tpu.matmul %147, %148, %cst_78 {dimension_numbers = #tpu.dot_dimension_numbers<[1], [0], [0], [1], [0, 0, 1, 1], [], []>} : vector<29x112xf32>, vector<112x116xf32>, vector<29x116xf32> -> vector<29x116xf32>
    %150 = vector.extract_strided_slice %146 {offsets = [1, 0], sizes = [29, 112], strides = [1, 1]} : vector<31x112xf32> to vector<29x112xf32>
    %c1512 = arith.constant 1512 : index
    %c0_79 = arith.constant 0 : index
    %151 = vector.load %arg3[%c1512, %c0_79] : memref<2272x144xf32, #tpu.memory_space<vmem>>, vector<112x116xf32>
    %cst_80 = arith.constant dense<0.000000e+00> : vector<29x116xf32>
    %152 = tpu.matmul %150, %151, %cst_80 {dimension_numbers = #tpu.dot_dimension_numbers<[1], [0], [0], [1], [0, 0, 1, 1], [], []>} : vector<29x112xf32>, vector<112x116xf32>, vector<29x116xf32> -> vector<29x116xf32>
    %153 = arith.addf %149, %152 : vector<29x116xf32>
    %154 = vector.extract_strided_slice %146 {offsets = [2, 0], sizes = [29, 112], strides = [1, 1]} : vector<31x112xf32> to vector<29x112xf32>
    %c1624 = arith.constant 1624 : index
    %c0_81 = arith.constant 0 : index
    %155 = vector.load %arg3[%c1624, %c0_81] : memref<2272x144xf32, #tpu.memory_space<vmem>>, vector<112x116xf32>
    %cst_82 = arith.constant dense<0.000000e+00> : vector<29x116xf32>
    %156 = tpu.matmul %154, %155, %cst_82 {dimension_numbers = #tpu.dot_dimension_numbers<[1], [0], [0], [1], [0, 0, 1, 1], [], []>} : vector<29x112xf32>, vector<112x116xf32>, vector<29x116xf32> -> vector<29x116xf32>
    %157 = arith.addf %153, %156 : vector<29x116xf32>
    %c1736 = arith.constant 1736 : index
    %c0_83 = arith.constant 0 : index
    %158 = vector.load %arg3[%c1736, %c0_83] : memref<2272x144xf32, #tpu.memory_space<vmem>>, vector<1x116xf32>
    %159 = vector.broadcast %158 : vector<1x116xf32> to vector<29x116xf32>
    %160 = arith.addf %157, %159 : vector<29x116xf32>
    %cst_84 = arith.constant 0.000000e+00 : f32
    %161 = vector.broadcast %cst_84 : f32 to vector<29x116xf32>
    %162 = arith.maximumf %160, %161 : vector<29x116xf32>
    %c1744 = arith.constant 1744 : index
    %c0_85 = arith.constant 0 : index
    %163 = vector.load %arg3[%c1744, %c0_85] : memref<2272x144xf32, #tpu.memory_space<vmem>>, vector<33x29xf32>
    %cst_86 = arith.constant dense<0.000000e+00> : vector<33x116xf32>
    %164 = tpu.matmul %163, %162, %cst_86 {dimension_numbers = #tpu.dot_dimension_numbers<[1], [0], [0], [1], [0, 0, 1, 1], [], []>} : vector<33x29xf32>, vector<29x116xf32>, vector<33x116xf32> -> vector<33x116xf32>
    %165 = vector.extract_strided_slice %164 {offsets = [0, 0], sizes = [30, 116], strides = [1, 1]} : vector<33x116xf32> to vector<30x116xf32>
    %c1784 = arith.constant 1784 : index
    %c0_87 = arith.constant 0 : index
    %166 = vector.load %arg3[%c1784, %c0_87] : memref<2272x144xf32, #tpu.memory_space<vmem>>, vector<116x128xf32>
    %cst_88 = arith.constant dense<0.000000e+00> : vector<30x128xf32>
    %167 = tpu.matmul %165, %166, %cst_88 {dimension_numbers = #tpu.dot_dimension_numbers<[1], [0], [0], [1], [0, 0, 1, 1], [], []>} : vector<30x116xf32>, vector<116x128xf32>, vector<30x128xf32> -> vector<30x128xf32>
    %168 = vector.extract_strided_slice %164 {offsets = [1, 0], sizes = [30, 116], strides = [1, 1]} : vector<33x116xf32> to vector<30x116xf32>
    %c1904 = arith.constant 1904 : index
    %c0_89 = arith.constant 0 : index
    %169 = vector.load %arg3[%c1904, %c0_89] : memref<2272x144xf32, #tpu.memory_space<vmem>>, vector<116x128xf32>
    %cst_90 = arith.constant dense<0.000000e+00> : vector<30x128xf32>
    %170 = tpu.matmul %168, %169, %cst_90 {dimension_numbers = #tpu.dot_dimension_numbers<[1], [0], [0], [1], [0, 0, 1, 1], [], []>} : vector<30x116xf32>, vector<116x128xf32>, vector<30x128xf32> -> vector<30x128xf32>
    %171 = arith.addf %167, %170 : vector<30x128xf32>
    %172 = vector.extract_strided_slice %164 {offsets = [2, 0], sizes = [30, 116], strides = [1, 1]} : vector<33x116xf32> to vector<30x116xf32>
    %c2024 = arith.constant 2024 : index
    %c0_91 = arith.constant 0 : index
    %173 = vector.load %arg3[%c2024, %c0_91] : memref<2272x144xf32, #tpu.memory_space<vmem>>, vector<116x128xf32>
    %cst_92 = arith.constant dense<0.000000e+00> : vector<30x128xf32>
    %174 = tpu.matmul %172, %173, %cst_92 {dimension_numbers = #tpu.dot_dimension_numbers<[1], [0], [0], [1], [0, 0, 1, 1], [], []>} : vector<30x116xf32>, vector<116x128xf32>, vector<30x128xf32> -> vector<30x128xf32>
    %175 = arith.addf %171, %174 : vector<30x128xf32>
    %176 = vector.extract_strided_slice %164 {offsets = [3, 0], sizes = [30, 116], strides = [1, 1]} : vector<33x116xf32> to vector<30x116xf32>
    %c2144 = arith.constant 2144 : index
    %c0_93 = arith.constant 0 : index
    %177 = vector.load %arg3[%c2144, %c0_93] : memref<2272x144xf32, #tpu.memory_space<vmem>>, vector<116x128xf32>
    %cst_94 = arith.constant dense<0.000000e+00> : vector<30x128xf32>
    %178 = tpu.matmul %176, %177, %cst_94 {dimension_numbers = #tpu.dot_dimension_numbers<[1], [0], [0], [1], [0, 0, 1, 1], [], []>} : vector<30x116xf32>, vector<116x128xf32>, vector<30x128xf32> -> vector<30x128xf32>
    %179 = arith.addf %175, %178 : vector<30x128xf32>
    %c2264 = arith.constant 2264 : index
    %c0_95 = arith.constant 0 : index
    %180 = vector.load %arg3[%c2264, %c0_95] : memref<2272x144xf32, #tpu.memory_space<vmem>>, vector<1x128xf32>
    %181 = vector.broadcast %180 : vector<1x128xf32> to vector<30x128xf32>
    %182 = arith.addf %179, %181 : vector<30x128xf32>
    %cst_96 = arith.constant 5.000000e-01 : f32
    %183 = vector.broadcast %cst_96 : f32 to vector<30x128xf32>
    %184 = arith.mulf %183, %182 : vector<30x128xf32>
    %185 = math.tanh %184 : vector<30x128xf32>
    %cst_97 = arith.constant 1.000000e+00 : f32
    %186 = vector.broadcast %cst_97 : f32 to vector<30x128xf32>
    %187 = arith.addf %185, %186 : vector<30x128xf32>
    %cst_98 = arith.constant 5.000000e-01 : f32
    %188 = vector.broadcast %cst_98 : f32 to vector<30x128xf32>
    %189 = arith.mulf %188, %187 : vector<30x128xf32>
    %c0_99 = arith.constant 0 : index
    %c0_100 = arith.constant 0 : index
    %190 = vector.load %arg4[%c0_99, %c0_100] : memref<32x128xf32, #tpu.memory_space<vmem>>, vector<30x128xf32>
    tpu.vector_store %arg4[%c0_99, %c0_100], %189 {strides = array<i32>} : memref<32x128xf32, #tpu.memory_space<vmem>>, vector<30x128xf32>,
    %c30 = arith.constant 30 : index
    %c0_101 = arith.constant 0 : index
    %191 = vector.load %arg4[%c30, %c0_101] : memref<32x128xf32, #tpu.memory_space<vmem>>, vector<1x32xf32>
    tpu.vector_store %arg4[%c30, %c0_101], %120 {strides = array<i32>} : memref<32x128xf32, #tpu.memory_space<vmem>>, vector<1x32xf32>,
    %c31 = arith.constant 31 : index
    %c0_102 = arith.constant 0 : index
    %192 = vector.load %arg4[%c31, %c0_102] : memref<32x128xf32, #tpu.memory_space<vmem>>, vector<1x32xf32>
    tpu.vector_store %arg4[%c31, %c0_102], %118 {strides = array<i32>} : memref<32x128xf32, #tpu.memory_space<vmem>>, vector<1x32xf32>,
    return
  }
}

</mosaic_0001>

<bundles_post_ra>
// kernel: forward.1
= control target key start
LH: loop header
LB: loop body
LE: loop exit
PB: predicated region body
PF: predicated region fallthrough
CT: control target
= control target key end

     0   :  { %vm50_vm0 = vcmask 1045504   ;;  %vm5089_vm1 = vmmov 1   ;;  %vm33_vm3 = vcmask 1046528   ;;  %vm41_vm4 = vcmask 244736   ;;  %s5093_s25 = smov 64   ;;  %s5094_s28 = smov 32   ;;  %s6400_s3 = inlined_call_operand.vmem [shape: f32[2272,144], index: 3, kind: input, shape index: {}]   ;;  %s6401_s0 = inlined_call_operand.vmem [shape: f32[30,30], index: 0, kind: input, shape index: {}]   ;;  %s6402_s1 = inlined_call_operand.vmem [shape: f32[1,32], index: 1, kind: input, shape index: {}]   ;;  %s6403_s2 = inlined_call_operand.vmem [shape: f32[1,32], index: 2, kind: input, shape index: {}]   ;;  %s6404_s4 = inlined_call_operand.vmem [shape: f32[32,128], index: 4, kind: output, shape index: {}]  }
   0x1   :  { %v25_v0 = vld [vmem:[%s6400_s3 + $0x80] sm:$0xff]  ;;  %v26_v1 = vld [vmem:[%s6400_s3 + $0x90] sm:$0xff]  ;;  %vm5141_vm2 = vmpackc.low %vm50_vm0, %vm5089_vm1  ;;  %vm632_vm5 = vcmask 228352   ;;  %vm639_vm6 = vcmask 1043456   ;;  %vm841_vm8 = vcmask 916480   ;;  %vm5091_vm9 = vmmov 0  }
   0x2   :  { %v350_v2 = vld [vmem:[%s6400_s3 + $0xc0] sm:$0xff]  ;;  %v4503_v3 = vpack.c.bf16 %v26_v1, %v25_v0  ;;  %v351_v4 = vld [vmem:[%s6400_s3 + $0xd0] sm:$0xff]  ;;  %v5159_v14 = vld [vmem:[%s6401_s0 + $0x8] sm:$0xff]  ;;  %vm1099_vm10 = vcmask 97280   ;;  %vm1257_vm11 = vcmask 392192   ;;  %vm1417_vm12 = vcmask 261120  }
   0x3   :  { %v27_v5 = vld [vmem:[%s6400_s3 + $0xa0] sm:$0xff]  ;;  %v28_v6 = vld [vmem:[%s6400_s3 + $0xb0] sm:$0x3f]  ;;  %v4533_v7 = vpack.c.bf16 %v351_v4, %v350_v2  ;;  %v35_v17 = vrot.slane %v5159_v14, 1  ;;  %v20_v24 = vld [vmem:[%s6401_s0 + $0x18] sm:$0x3f] }
   0x4   :  { %v4507_v8 = vpack.c.bf16 %v28_v6, %v27_v5  ;;  %v352_v10 = vld [vmem:[%s6400_s3 + $0xe0] sm:$0xff]  ;;  %v353_v11 = vld [vmem:[%s6400_s3 + $0xf0] sm:$0x3f]  ;;  %4504 = vmatprep.subr.bf16.mxu0 %v4503_v3  ;;  %v39_v27 = vrot.slane %v20_v24, 1  ;;  %v240_v48 = vrot.slane %v5159_v14, 2  ;;  %v244_v51 = vrot.slane %v20_v24, 2  ;;  %vm5299_vm7 = vmpackc.low %vm639_vm6, %vm5089_vm1 }
   0x5   :  { %v4537_v12 = vpack.c.bf16 %v353_v11, %v352_v10  ;;  %v5154_v13 = vld [vmem:[%s6401_s0] sm:$0xff]  ;;  %v5164_v15 = vld [vmem:[%s6401_s0 + $0x10] sm:$0xff]  ;;  %4534 = vmatprep.subr.bf16.mxu1 %v4533_v7  ;;  %4506 = vmatpush3.bf16.msra.mxu0 %v4503_v3  ;;  %vm1494_vm13 = vcmask 195584   ;;  %s5095_s18 = smov 96   ;;  %vm3496_vm14 = vcmask 253952   ;;  %vm2146_vm15 = vcmask 130048  }
   0x6   :  { %v34_v16 = vrot.slane %v5154_v13, 1  ;;  %v37_v18 = vrot.slane %v5164_v15, 1  ;;  %v21_v19 = vld [vmem:[%s6400_s3] sm:$0xff]  ;;  %v22_v20 = vld [vmem:[%s6400_s3 + $0x10] sm:$0xff]  ;;  %4536 = vmatpush3.bf16.msra.mxu1 %v4533_v7  ;;  %4509 = vmatprep.subr.msk.bf16.mxu0 %vm5141_vm2, %v4507_v8  ;;  %v239_v47 = vrot.slane %v5154_v13, 2  ;;  %v242_v50 = vrot.slane %v5164_v15, 2 }
   0x7   :  { %v346_v21 = vld [vmem:[%s6400_s3 + $0x40] sm:$0xff]  ;;  %v4513_v22 = vpack.c.bf16 %v22_v20, %v21_v19  ;;  %v347_v23 = vld [vmem:[%s6400_s3 + $0x50] sm:$0xff]  ;;  %4539 = vmatprep.subr.msk.bf16.mxu1 %vm5141_vm2, %v4537_v12 }
   0x8   :  { %v36_v25 = vsel %vm33_vm3, %v34_v16, %v35_v17  ;;  %v4543_v26 = vpack.c.bf16 %v347_v23, %v346_v21  ;;  %v23_v28 = vld [vmem:[%s6400_s3 + $0x20] sm:$0xff]  ;;  %v24_v29 = vld [vmem:[%s6400_s3 + $0x30] sm:$0x3f]  ;;  %v38_v30 = vsel %vm33_vm3, %v35_v17, %v37_v18  ;;  %v40_v33 = vsel %vm33_vm3, %v37_v18, %v39_v27 }
   0x9   :  { %3924 = vmatprep.mubr.msk.f32.mxu0 %vm41_vm4, %v36_v25  ;;  %3966 = vmatprep.mubr.msk.f32.mxu1 %vm41_vm4, %v36_v25  ;;  %v348_v31 = vld [vmem:[%s6400_s3 + $0x60] sm:$0xff]  ;;  %v349_v32 = vld [vmem:[%s6400_s3 + $0x70] sm:$0x3f]  ;;  %v4517_v34 = vpack.c.bf16 %v24_v29, %v23_v28  ;;  %v241_v52 = vsel %vm50_vm0, %v239_v47, %v240_v48  ;;  %v243_v53 = vsel %vm50_vm0, %v240_v48, %v242_v50 }
   0xa   :  { %4512 = vmatpush3.bf16.msk.msra.mxu0 %vm5141_vm2, %v4507_v8  ;;  %4542 = vmatpush3.bf16.msk.msra.mxu1 %vm5141_vm2, %v4537_v12  ;;  %v4547_v35 = vpack.c.bf16 %v349_v32, %v348_v31  ;;  %v235_v36 = vld [vmem:[%s6400_s3 + $0x100] sm:$0xff]  ;;  %v236_v37 = vld [vmem:[%s6400_s3 + $0x110] sm:$0xff]  ;;  %v245_v54 = vsel %vm50_vm0, %v242_v50, %v244_v51 }
   0xb   :  { %4514 = vmatprep.subr.bf16.mxu0 %v4513_v22  ;;  %4544 = vmatprep.subr.bf16.mxu1 %v4543_v26  ;;  %v530_v38 = vld [vmem:[%s6400_s3 + $0x140] sm:$0xff]  ;;  %v531_v39 = vld [vmem:[%s6400_s3 + $0x150] sm:$0xff]  ;;  %v4523_v40 = vpack.c.bf16 %v236_v37, %v235_v36 }
   0xc   :  { %v4553_v41 = vpack.c.bf16 %v531_v39, %v530_v38  ;;  %v237_v42 = vld [vmem:[%s6400_s3 + $0x120] sm:$0xff]  ;;  %v238_v43 = vld [vmem:[%s6400_s3 + $0x130] sm:$0x3f] }
   0xd   :  { %3925 = vmatmul.mubr.msk.f32.vlgmr.msra.gmra.mrb[0].mxu0 %vm41_vm4, %v38_v30  ;;  %3967 = vmatmul.mubr.msk.f32.vlgmr.msra.gmra.mrb[0].mxu1 %vm41_vm4, %v38_v30  ;;  %v532_v44 = vld [vmem:[%s6400_s3 + $0x160] sm:$0xff]  ;;  %v533_v45 = vld [vmem:[%s6400_s3 + $0x170] sm:$0x3f]  ;;  %v4527_v46 = vpack.c.bf16 %v238_v43, %v237_v42 }
   0xe   :  { %4516 = vmatpush3.bf16.msra.mxu0 %v4513_v22  ;;  %4546 = vmatpush3.bf16.msra.mxu1 %v4543_v26  ;;  %v4557_v49 = vpack.c.bf16 %v533_v45, %v532_v44  ;;  %v630_v55 = vld [vmem:[%s6400_s3 + $0x190] sm:$0xff]  ;;  %v823_v6 = vld [vmem:[%s6400_s3 + $0x2c0] sm:$0xff] }
   0xf   :  { %3927 = vmatprep.mubr.msk.f32.mxu0 %vm41_vm4, %v40_v33  ;;  %3969 = vmatprep.mubr.msk.f32.mxu1 %vm41_vm4, %v40_v33  ;;  %v718_v56 = vld [vmem:[%s6400_s3 + $0x1b0] sm:$0xff]  ;;  %v827_v18 = vld [vmem:[%s6400_s3 + $0x300] sm:$0xff] }
  0x10   :  { %4519 = vmatprep.subr.msk.bf16.mxu0 %vm5141_vm2, %v4517_v34  ;;  %4549 = vmatprep.subr.msk.bf16.mxu1 %vm5141_vm2, %v4547_v35  ;;  %v822_v5 = vld [vmem:[%s6400_s3 + $0x2b0] sm:$0xff]  ;;  %v829_v21 = vld [vmem:[%s6400_s3 + $0x320] sm:$0xff] }
  0x11   :  { %3928 = vmatmul.mubr.msk.f32.gmra.mrb[2].mxu0 %vm41_vm4, %v39_v27  ;;  %3970 = vmatmul.mubr.msk.f32.gmra.mrb[2].mxu1 %vm41_vm4, %v39_v27  ;;  %v4583_v11 = vpack.c.bf16 %v823_v6, %v822_v5  ;;  %v824_v12 = vld [vmem:[%s6400_s3 + $0x2d0] sm:$0xff]  ;;  %v833_v27 = vld [vmem:[%s6400_s3 + $0x360] sm:$0xff] }
  0x12   :  { %4522 = vmatpush3.bf16.msk.msra.mxu0 %vm5141_vm2, %v4517_v34  ;;  %4552 = vmatpush3.bf16.msk.msra.mxu1 %vm5141_vm2, %v4547_v35  ;;  %v826_v17 = vld [vmem:[%s6400_s3 + $0x2f0] sm:$0xff]  ;;  %v835_v30 = vld [vmem:[%s6400_s3 + $0x380] sm:$0xff] }
  0x13   :  { %3938 = vmatprep.mubr.msk.f32.mxu0 %vm41_vm4, %v5154_v13  ;;  %3980 = vmatprep.mubr.msk.f32.mxu1 %vm41_vm4, %v5154_v13  ;;  %v825_v13 = vld [vmem:[%s6400_s3 + $0x2e0] sm:$0xff]  ;;  %v4591_v19 = vpack.c.bf16 %v827_v18, %v826_v17  ;;  %v828_v20 = vld [vmem:[%s6400_s3 + $0x310] sm:$0xff] }
  0x14   :  { %4524 = vmatprep.subr.bf16.mxu0 %v4523_v40  ;;  %4554 = vmatprep.subr.bf16.mxu1 %v4553_v41  ;;  %v4587_v16 = vpack.c.bf16 %v825_v13, %v824_v12  ;;  %v4595_v22 = vpack.c.bf16 %v829_v21, %v828_v20  ;;  %v830_v23 = vld [vmem:[%s6400_s3 + $0x330] sm:$0xff]  ;;  %v809_v33 = vld [vmem:[%s6400_s3 + $0x1e0] sm:$0xff] }
  0x15   :  { %3939 = vmatmul.mubr.msk.f32.vlgmr.msra.gmra.mrb[0].mxu0 %vm41_vm4, %v5159_v14  ;;  %3981 = vmatmul.mubr.msk.f32.vlgmr.msra.gmra.mrb[0].mxu1 %vm41_vm4, %v5159_v14  ;;  %v631_v14 = vld [vmem:[%s6400_s3 + $0x1a0] sm:$0x3f]  ;;  %v832_v26 = vld [vmem:[%s6400_s3 + $0x350] sm:$0xff] }
  0x16   :  { %4526 = vmatpush3.bf16.msra.mxu0 %v4523_v40  ;;  %4556 = vmatpush3.bf16.msra.mxu1 %v4553_v41  ;;  %v4603_v28 = vpack.c.bf16 %v833_v27, %v832_v26  ;;  %v834_v29 = vld [vmem:[%s6400_s3 + $0x370] sm:$0xff]  ;;  %v803_v37 = vld [vmem:[%s6400_s3 + $0x180] ss:$0 sm:$0xff] }
  0x17   :  { %3941 = vmatprep.mubr.msk.f32.mxu0 %vm41_vm4, %v5164_v15  ;;  %3983 = vmatprep.mubr.msk.f32.mxu1 %vm41_vm4, %v5164_v15  ;;  %v719_v15 = vld [vmem:[%s6400_s3 + $0x1c0] sm:$0x3f]  ;;  %v4607_v31 = vpack.c.bf16 %v835_v30, %v834_v29  ;;  %v808_v32 = vld [vmem:[%s6400_s3 + $0x1d0] sm:$0xff]  ;;  %v5090_v29 = vmov 0.0|0.0   ;;  %v5092_v30 = vmov 0.0  }
  0x18   :  { %4529 = vmatprep.subr.msk.bf16.mxu0 %vm5141_vm2, %v4527_v46  ;;  %4559 = vmatprep.subr.msk.bf16.mxu1 %vm5141_vm2, %v4557_v49  ;;  %v4611_v34 = vpack.c.bf16 %v809_v33, %v808_v32  ;;  %v810_v48 = vld [vmem:[%s6400_s3 + $0x1f0] sm:$0xff]  ;;  %v1003_v12 = vld [vmem:[%s6400_s3 + $0x3c0] sm:$0xff] }
  0x19   :  { %3942 = vmatmul.mubr.msk.f32.gmra.mrb[2].mxu0 %vm41_vm4, %v20_v24  ;;  %3984 = vmatmul.mubr.msk.f32.gmra.mrb[2].mxu1 %vm41_vm4, %v20_v24  ;;  %v831_v24 = vld [vmem:[%s6400_s3 + $0x340] sm:$0xff]  ;;  %v1000_v6 = vld [vmem:[%s6400_s3 + $0x390] sm:$0xff] }
  0x1a   :  { %4532 = vmatpush3.bf16.msk.msra.mxu0 %vm5141_vm2, %v4527_v46  ;;  %4562 = vmatpush3.bf16.msk.msra.mxu1 %vm5141_vm2, %v4557_v49  ;;  %v4599_v25 = vpack.c.bf16 %v831_v24, %v830_v23  ;;  %v811_v49 = vld [vmem:[%s6400_s3 + $0x200] sm:$0xff]  ;;  %v1006_v17 = vld [vmem:[%s6400_s3 + $0x3f0] sm:$0xff] }
  0x1b   :  { %3952 = vmatprep.mubr.msk.f32.mxu0 %vm41_vm4, %v241_v52  ;;  %3994 = vmatprep.mubr.msk.f32.mxu1 %vm41_vm4, %v241_v52  ;;  %v1007_v18 = vld [vmem:[%s6400_s3 + $0x400] sm:$0xff]  ;;  %v1008_v20 = vld [vmem:[%s6400_s3 + $0x410] sm:$0xff] }
  0x1c   :  { %v1009_v21 = vld [vmem:[%s6400_s3 + $0x420] sm:$0xff]  ;;  %v1010_v23 = vld [vmem:[%s6400_s3 + $0x430] sm:$0xff] }
  0x1d   :  { %3953 = vmatmul.mubr.msk.f32.vlgmr.msra.gmra.mrb[0].mxu0 %vm41_vm4, %v243_v53  ;;  %3995 = vmatmul.mubr.msk.f32.vlgmr.msra.gmra.mrb[0].mxu1 %vm41_vm4, %v243_v53  ;;  %v4615_v53 = vpack.c.bf16 %v811_v49, %v810_v48  ;;  %v1011_v24 = vld [vmem:[%s6400_s3 + $0x440] sm:$0xff]  ;;  %v1012_v26 = vld [vmem:[%s6400_s3 + $0x450] sm:$0xff] }
  0x1e   :  { %3955 = vmatprep.mubr.msk.f32.mxu0 %vm41_vm4, %v245_v54  ;;  %3997 = vmatprep.mubr.msk.f32.mxu1 %vm41_vm4, %v245_v54  ;;  %v1013_v27 = vld [vmem:[%s6400_s3 + $0x460] sm:$0xff] }
  0x1f   :  { %v2420_v9 = vld [vmem:[%s6400_s3 + $0xae0] sm:$0x7f] }
  0x21   :  { %3956 = vmatmul.mubr.msk.f32.gmra.mrb[2].mxu0 %vm41_vm4, %v244_v51  ;;  %3998 = vmatmul.mubr.msk.f32.gmra.mrb[2].mxu1 %vm41_vm4, %v244_v51  ;;  %vm2421_vm4 = vcmask 113664  }
  0x22   :  { %4008 = vmatprep.mubr.msk.f32.mxu0 %vm632_vm5, %v630_v55  ;;  %4019 = vmatprep.mubr.msk.f32.mxu1 %vm632_vm5, %v718_v56  ;;  %v812_v55 = vld [vmem:[%s6400_s3 + $0x210] sm:$0xff]  ;;  %v813_v56 = vld [vmem:[%s6400_s3 + $0x220] sm:$0xff] }
  0xf0   :  { %v3954_v57 = vpop.f32.mrb[0].mxu0  ;;  %v3996_v58 = vpop.f32.mrb[0].mxu1 }
  0xf1   :  { %v323_v59 = vpop.f32.mrb[1].mxu0  ;;  %v627_v60 = vmax.f32 %v3954_v57, %v3996_v58  ;;  %v603_v61 = vpop.f32.mrb[1].mxu1  ;;  %v4619_v57 = vpack.c.bf16 %v813_v56, %v812_v55  ;;  %v814_v58 = vld [vmem:[%s6400_s3 + $0x230] sm:$0xff]  ;;  %v1335_v55 = vld [vmem:[%s6400_s3 + $0x540] sm:$0xff] }
  0xf2   :  { %v626_v62 = vmax.f32 %v323_v59, %v603_v61  ;;  %v815_v59 = vld [vmem:[%s6400_s3 + $0x240] sm:$0xff]  ;;  %v816_v61 = vld [vmem:[%s6400_s3 + $0x250] sm:$0xff] }
  0xf3   :  { %v1336_v56 = vld [vmem:[%s6400_s3 + $0x550] sm:$0xff] }
  0xf4   :  { %v3957_v63 = vpop.f32.mrb[2].mxu0  ;;  %v4563_v0 = vpack.c.bf16 %v627_v60, %v626_v62  ;;  %v3999_v1 = vpop.f32.mrb[2].mxu1  ;;  %v4623_v60 = vpack.c.bf16 %v815_v59, %v814_v58  ;;  %v817_v62 = vld [vmem:[%s6400_s3 + $0x260] sm:$0xff]  ;;  %v1413_v59 = vld [vmem:[%s6400_s3 + $0x690] sm:$0xff] }
  0xf5   :  { %v333_v2 = vpop.f32.mrb[3].mxu0  ;;  %v629_v3 = vmax.f32 %v3957_v63, %v3999_v1  ;;  %v613_v4 = vpop.f32.mrb[3].mxu1  ;;  %v4627_v63 = vpack.c.bf16 %v817_v62, %v816_v61  ;;  %v819_v1 = vld [vmem:[%s6400_s3 + $0x280] sm:$0xff]  ;;  %v1415_v62 = vld [vmem:[%s6400_s3 + $0x6b0] sm:$0xff] }
  0xf6   :  { %v628_v7 = vmax.f32 %v333_v2, %v613_v4  ;;  %4564 = vmatprep.subr.bf16.mxu0 %v4563_v0  ;;  %4574 = vmatprep.subr.bf16.mxu1 %v4563_v0  ;;  %v821_v4 = vld [vmem:[%s6400_s3 + $0x2a0] sm:$0xff] }
  0xf7   :  { %4566 = vmatpush3.bf16.msra.mxu0 %v4563_v0  ;;  %4576 = vmatpush3.bf16.msra.mxu1 %v4563_v0  ;;  %v818_v0 = vld [vmem:[%s6400_s3 + $0x270] sm:$0xff]  ;;  %v1412_v58 = vld [vmem:[%s6400_s3 + $0x680] sm:$0xff] }
  0xf8   :  { %v4567_v10 = vpack.c.bf16 %v629_v3, %v628_v7  ;;  %v4631_v2 = vpack.c.bf16 %v819_v1, %v818_v0  ;;  %v820_v3 = vld [vmem:[%s6400_s3 + $0x290] sm:$0xff]  ;;  %v1001_v7 = vld [vmem:[%s6400_s3 + $0x3a0] sm:$0xff]  ;;  %v4694_v61 = vpack.c.bf16 %v1413_v59, %v1412_v58  ;;  %v1988_v58 = vld [vmem:[%s6400_s3 + $0x6e8] sm:$0xff] }
  0xf9   :  { %v4635_v5 = vpack.c.bf16 %v821_v4, %v820_v3  ;;  %v1411_v0 = vld [vmem:[%s6402_s1] sm:$0x1]  ;;  %v1985_v59 = vld [vmem:[%s6400_s3 + $0x6d0] sm:$0xff] }
  0xfa   :  { %4569 = vmatprep.subr.msk.bf16.mxu0 %vm5299_vm7, %v4567_v10  ;;  %4579 = vmatprep.subr.msk.bf16.mxu1 %vm5299_vm7, %v4567_v10  ;;  %v1491_v1 = vld [vmem:[%s6400_s3 + $0x560] sm:$0xff] }
  0xfb   :  { %4572 = vmatpush3.bf16.msk.msra.mxu0 %vm5299_vm7, %v4567_v10  ;;  %4582 = vmatpush3.bf16.msk.msra.mxu1 %vm5299_vm7, %v4567_v10  ;;  %v4639_v10 = vpack.c.bf16 %v1001_v7, %v1000_v6  ;;  %v1493_v4 = vld [vmem:[%s6400_s3 + $0x580] sm:$0xff] }
  0xfc   :  { %4584 = vmatprep.subr.bf16.mxu0 %v4583_v11  ;;  %4667 = vmatprep.subr.bf16.mxu1 %v5090_v29 }
  0xfe   :  { %4009 = vmatmul.mubr.msk.f32.vlgmr.msra.gmra.mrb[4].mxu0 %vm632_vm5, %v631_v14  ;;  %4020 = vmatmul.mubr.msk.f32.vlgmr.msra.gmra.mrb[4].mxu1 %vm632_vm5, %v719_v15  ;;  %v1004_v14 = vld [vmem:[%s6400_s3 + $0x3d0] sm:$0xff]  ;;  %v1005_v15 = vld [vmem:[%s6400_s3 + $0x3e0] sm:$0xff] }
  0xff   :  { %4586 = vmatpush3.bf16.msra.mxu0 %v4583_v11  ;;  %v1002_v11 = vld [vmem:[%s6400_s3 + $0x3b0] sm:$0xff]  ;;  %4119 = vmatprep.mubr.msk.f32.mxu1 %vm5091_vm9, %v5092_v30 }
 0x100   :  { %4588 = vmatprep.subr.bf16.mxu0 %v4587_v16  ;;  %v4643_v13 = vpack.c.bf16 %v1003_v12, %v1002_v11 }
 0x103   :  { %4590 = vmatpush3.bf16.msra.mxu0 %v4587_v16  ;;  %v4647_v16 = vpack.c.bf16 %v1005_v15, %v1004_v14  ;;  %v1570_v14 = vld [vmem:[%s6400_s3 + $0x5a0] sm:$0xff] }
 0x104   :  { %4592 = vmatprep.subr.bf16.mxu0 %v4591_v19 }
 0x107   :  { %4594 = vmatpush3.bf16.msra.mxu0 %v4591_v19  ;;  %v4651_v19 = vpack.c.bf16 %v1007_v18, %v1006_v17  ;;  %v1571_v18 = vld [vmem:[%s6400_s3 + $0x5b0] sm:$0xff] }
 0x108   :  { %4596 = vmatprep.subr.bf16.mxu0 %v4595_v22 }
 0x10b   :  { %4598 = vmatpush3.bf16.msra.mxu0 %v4595_v22  ;;  %v4655_v22 = vpack.c.bf16 %v1009_v21, %v1008_v20  ;;  %v1647_v20 = vld [vmem:[%s6400_s3 + $0x5d0] sm:$0xff] }
 0x10c   :  { %4600 = vmatprep.subr.bf16.mxu0 %v4599_v25 }
 0x10f   :  { %4602 = vmatpush3.bf16.msra.mxu0 %v4599_v25  ;;  %v4659_v25 = vpack.c.bf16 %v1011_v24, %v1010_v23  ;;  %v1648_v23 = vld [vmem:[%s6400_s3 + $0x5e0] sm:$0xff]  ;;  %v1723_v24 = vld [vmem:[%s6400_s3 + $0x5f0] sm:$0xff] }
 0x110   :  { %4604 = vmatprep.subr.bf16.mxu0 %v4603_v28 }
 0x113   :  { %4606 = vmatpush3.bf16.msra.mxu0 %v4603_v28  ;;  %v4663_v28 = vpack.c.bf16 %v1013_v27, %v1012_v26 }
 0x114   :  { %4608 = vmatprep.subr.bf16.mxu0 %v4607_v31 }
 0x117   :  { %4610 = vmatpush3.bf16.msra.mxu0 %v4607_v31 }
 0x118   :  { %4612 = vmatprep.subr.bf16.mxu0 %v4611_v34 }
 0x1d1   :  { %v4010_v35 = vpop.f32.mrb[4].mxu0  ;;  %v4021_v36 = vpop.f32.mrb[4].mxu1 }
 0x1d2   :  { %v802_v38 = vmax.f32 %v4010_v35, %v4021_v36  ;;  %v709_v39 = vpop.f32.mrb[5].mxu0  ;;  %v792_v40 = vpop.f32.mrb[5].mxu1  ;;  %v1251_v35 = vld [vmem:[%s6400_s3 + $0x4a0] sm:$0xff]  ;;  %v1252_v36 = vld [vmem:[%s6400_s3 + $0x4b0] sm:$0xff] }
 0x1d3   :  { %v801_v41 = vmax.f32 %v709_v39, %v792_v40  ;;  %v1253_v39 = vld [vmem:[%s6400_s3 + $0x4c0] sm:$0xff]  ;;  %v1254_v40 = vld [vmem:[%s6400_s3 + $0x4d0] sm:$0xff] }
 0x1d4   :  { %v805_v42 = vadd.f32 %v803_v37, %v802_v38  ;;  %v4676_v38 = vpack.c.bf16 %v1252_v36, %v1251_v35  ;;  %v4679_v8 = vpack.c.bf16 %v1254_v40, %v1253_v39  ;;  %v1802_v35 = vld [vmem:[%s6400_s3 + $0x640] sm:$0xff]  ;;  %v1877_v36 = vld [vmem:[%s6400_s3 + $0x650] sm:$0xff] }
 0x1d5   :  { %v804_v43 = vadd.f32 %v803_v37, %v801_v41  ;;  %v1176_v37 = vld [vmem:[%s6400_s3 + $0x490] sm:$0x3f]  ;;  %v1255_v41 = vld [vmem:[%s6400_s3 + $0x4e0] sm:$0xff] }
 0x1d6   :  { %v5364_v44 = vmax.f32 %v805_v42, 0.0  ;;  %v1256_v42 = vld [vmem:[%s6400_s3 + $0x4f0] sm:$0xff] }
 0x1d7   :  { %v806_v45 = vmax.f32 %v804_v43, 0.0  ;;  %v4682_v43 = vpack.c.bf16 %v1256_v42, %v1255_v41  ;;  %v1879_v40 = vld [vmem:[%s6400_s3 + $0x670] sm:$0xff]  ;;  %v1416_v41 = vld [vmem:[%s6400_s3 + $0x6c0] ss:$0 sm:$0xff] }
 0x1d8   :  { %v839_v46 = vrot.slane %v5364_v44, 1  ;;  %v1015_v47 = vrot.slane %v5364_v44, 2 }
 0x1d9   :  { %v838_v50 = vrot.slane %v806_v45, 1  ;;  %v1014_v51 = vrot.slane %v806_v45, 2 }
 0x1db   :  { %v840_v52 = vsel %vm33_vm3, %v838_v50, %v839_v46  ;;  %v1016_v54 = vsel %vm50_vm0, %v1014_v51, %v1015_v47 }
 0x1dc   :  { %4050 = vmatprep.mubr.msk.f32.mxu0 %vm841_vm8, %v840_v52  ;;  %v1333_v52 = vld [vmem:[%s6400_s3 + $0x520] sm:$0xff] }
 0x1dd   :  { %4051 = vmatmul.mubr.msk.f32.vlgmr.msra.gmra.mrb[6].mxu0 %vm841_vm8, %v839_v46  ;;  %v1331_v46 = vld [vmem:[%s6400_s3 + $0x500] sm:$0xff] }
 0x1de   :  { %4614 = vmatpush3.bf16.msra.mxu0 %v4611_v34  ;;  %4081 = vmatprep.mubr.msk.f32.mxu0 %vm841_vm8, %v806_v45  ;;  %v1098_v34 = vld [vmem:[%s6400_s3 + $0x480] sm:$0x3f] }
 0x1df   :  { %4616 = vmatprep.subr.bf16.mxu0 %v4615_v53 }
 0x1e2   :  { %4618 = vmatpush3.bf16.msra.mxu0 %v4615_v53  ;;  %v1334_v53 = vld [vmem:[%s6400_s3 + $0x530] sm:$0xff] }
 0x1e3   :  { %4620 = vmatprep.subr.bf16.mxu0 %v4619_v57 }
 0x1e6   :  { %4622 = vmatpush3.bf16.msra.mxu0 %v4619_v57  ;;  %v4691_v57 = vpack.c.bf16 %v1336_v56, %v1335_v55 }
 0x1e7   :  { %4624 = vmatprep.subr.bf16.mxu0 %v4623_v60 }
 0x1ea   :  { %4626 = vmatpush3.bf16.msra.mxu0 %v4623_v60  ;;  %v1414_v60 = vld [vmem:[%s6400_s3 + $0x6a0] sm:$0xff] }
 0x1eb   :  { %4628 = vmatprep.subr.bf16.mxu0 %v4627_v63 }
 0x1ee   :  { %4630 = vmatpush3.bf16.msra.mxu0 %v4627_v63  ;;  %v4697_v63 = vpack.c.bf16 %v1415_v62, %v1414_v60  ;;  %v1990_v62 = vld [vmem:[%s6400_s3 + $0x6f8] sm:$0xff] }
 0x1ef   :  { %4632 = vmatprep.subr.bf16.mxu0 %v4631_v2 }
 0x1f2   :  { %4634 = vmatpush3.bf16.msra.mxu0 %v4631_v2  ;;  %v1492_v2 = vld [vmem:[%s6400_s3 + $0x570] sm:$0xff] }
 0x1f3   :  { %4636 = vmatprep.subr.bf16.mxu0 %v4635_v5  ;;  %v4700_v3 = vpack.c.bf16 %v1492_v2, %v1491_v1  ;;  %v1989_v2 = vld [vmem:[%s6400_s3 + $0x6f0] sm:$0xff] }
 0x1f6   :  { %4638 = vmatpush3.bf16.msra.mxu0 %v4635_v5 }
 0x1f7   :  { %4640 = vmatprep.subr.bf16.mxu0 %v4639_v10 }
 0x1f9   :  { %4082 = vmatmul.mubr.msk.f32.vlgmr.msra.gmra.mrb[6].mxu0 %vm841_vm8, %v5364_v44 }
 0x1fa   :  { %4642 = vmatpush3.bf16.msra.mxu0 %v4639_v10  ;;  %4112 = vmatprep.mubr.msk.f32.mxu0 %vm841_vm8, %v1016_v54  ;;  %v4688_v54 = vpack.c.bf16 %v1334_v53, %v1333_v52  ;;  %v1408_v10 = vld [vmem:[%s6400_s3 + $0x470] ss:$0 sm:$0xff] }
 0x1fb   :  { %4644 = vmatprep.subr.bf16.mxu0 %v4643_v13 }
 0x1fe   :  { %4646 = vmatpush3.bf16.msra.mxu0 %v4643_v13  ;;  %v1569_v13 = vld [vmem:[%s6400_s3 + $0x590] sm:$0xff] }
 0x1ff   :  { %4648 = vmatprep.subr.bf16.mxu0 %v4647_v16 }
 0x202   :  { %4650 = vmatpush3.bf16.msra.mxu0 %v4647_v16  ;;  %v4703_v16 = vpack.c.bf16 %v1570_v14, %v1569_v13  ;;  %v2309_v14 = vld [vmem:[%s6400_s3 + $0x9c0] sm:$0xff] }
 0x203   :  { %4652 = vmatprep.subr.bf16.mxu0 %v4651_v19 }
 0x206   :  { %4654 = vmatpush3.bf16.msra.mxu0 %v4651_v19  ;;  %v1646_v19 = vld [vmem:[%s6400_s3 + $0x5c0] sm:$0xff] }
 0x207   :  { %4656 = vmatprep.subr.bf16.mxu0 %v4655_v22  ;;  %v4706_v21 = vpack.c.bf16 %v1647_v20, %v1646_v19  ;;  %v2311_v19 = vld [vmem:[%s6400_s3 + $0x9e0] sm:$0xff]  ;;  %v2312_v20 = vld [vmem:[%s6400_s3 + $0x9f0] sm:$0xff] }
 0x20a   :  { %4658 = vmatpush3.bf16.msra.mxu0 %v4655_v22 }
 0x20b   :  { %4660 = vmatprep.subr.bf16.mxu0 %v4659_v25 }
 0x20e   :  { %4662 = vmatpush3.bf16.msra.mxu0 %v4659_v25  ;;  %v1724_v25 = vld [vmem:[%s6400_s3 + $0x600] sm:$0xff] }
 0x20f   :  { %4664 = vmatprep.subr.bf16.mxu0 %v4663_v28  ;;  %v4709_v26 = vpack.c.bf16 %v1724_v25, %v1723_v24  ;;  %v2314_v24 = vld [vmem:[%s6400_s3 + $0xa10] sm:$0xff] }
 0x212   :  { %4666 = vmatpush3.bf16.msra.mxu0 %v4663_v28  ;;  %v1725_v28 = vld [vmem:[%s6400_s3 + $0x610] sm:$0xff] }
 0x213   :  { %4779 = vmatprep.subr.bf16.mxu0 %v5090_v29 }
 0x215   :  { %4113 = vmatmul.mubr.msk.f32.vlgmr.msra.gmra.mrb[6].mxu0 %vm841_vm8, %v1015_v47  ;;  %v1332_v47 = vld [vmem:[%s6400_s3 + $0x510] sm:$0xff] }
 0x216   :  { %v4685_v49 = vpack.c.bf16 %v1332_v47, %v1331_v46  ;;  %v3562_v46 = vld [vmem:[%s6403_s2] ss:$0 sm:$0xff] }
 0x2e8   :  { %v4114_v31 = vpop.f32.mrb[6].mxu0 }
 0x2e9   :  { %v1087_v32 = vpop.f32.mrb[7].mxu0 }
 0x2ea   :  { %v4668_v33 = vpack.c.bf16 %v4114_v31, %v1087_v32  ;;  %v1800_v31 = vld [vmem:[%s6400_s3 + $0x620] sm:$0xff]  ;;  %v1801_v32 = vld [vmem:[%s6400_s3 + $0x630] sm:$0xff] }
 0x2ec   :  { %4670 = vmatpush3.bf16.msk.msra.mxu1 %vm5299_vm7, %v4668_v33 }
 0x2ed   :  { %4671 = vmatprep.subr.bf16.mxu1 %v5090_v29 }
 0x2ef   :  { %4120 = vmatmul.mubr.msk.f32.vlgmr.msra.gmra.mrb[6].mxu1 %vm1099_vm10, %v1098_v34 }
 0x2f0   :  { %4674 = vmatpush3.bf16.msk.msra.mxu1 %vm5299_vm7, %v4668_v33  ;;  %4126 = vmatprep.mubr.msk.f32.mxu1 %vm5091_vm9, %v5092_v30  ;;  %v4712_v33 = vpack.c.bf16 %v1801_v32, %v1800_v31  ;;  %v2116_v31 = vld [vmem:[%s6400_s3 + $0x860] sm:$0xff]  ;;  %v2117_v32 = vld [vmem:[%s6400_s3 + $0x870] sm:$0xff]  ;;  %vm2879_vm7 = vcmask 236544  }
 0x2f1   :  { %4675 = vmatprep.subr.bf16.mxu1 %v5090_v29 }
 0x2f3   :  { %4127 = vmatmul.mubr.msk.f32.vlgmr.msra.gmra.mrb[8].mxu1 %vm1099_vm10, %v1176_v37  ;;  %v1878_v37 = vld [vmem:[%s6400_s3 + $0x660] sm:$0xff] }
 0x2f4   :  { %4677 = vmatpush3.bf16.msra.mxu1 %v4676_v38  ;;  %4141 = vmatprep.mubr.msk.f32.mxu1 %vm5091_vm9, %v5092_v30  ;;  %v4715_v38 = vpack.c.bf16 %v1878_v37, %v1877_v36 }
 0x2f5   :  { %4678 = vmatprep.subr.bf16.mxu1 %v5090_v29 }
 0x2f8   :  { %4680 = vmatpush3.bf16.msra.mxu1 %v4679_v8 }
 0x2f9   :  { %4681 = vmatprep.subr.bf16.mxu1 %v5090_v29 }
 0x2fc   :  { %4683 = vmatpush3.bf16.msra.mxu1 %v4682_v43 }
 0x2fd   :  { %4684 = vmatprep.subr.bf16.mxu1 %v5090_v29 }
 0x3c2   :  { %v1172_v44 = vpop.f32.mrb[6].mxu1 }
 0x3c3   :  { %v4121_v45 = vpop.f32.mrb[7].mxu1 }
 0x3c6   :  { %v1246_v48 = vpop.f32.mrb[8].mxu1 }
 0x3c7   :  { %v1250_v50 = vmax.f32 %v1172_v44, %v1246_v48  ;;  %v4128_v51 = vpop.f32.mrb[9].mxu1 }
 0x3c9   :  { %4142 = vmatmul.mubr.msk.f32.vlgmr.msra.gmra.mrb[10].mxu1 %vm1257_vm11, %v1250_v50 }
 0x3ca   :  { %4686 = vmatpush3.bf16.msra.mxu1 %v4685_v49  ;;  %4156 = vmatprep.mubr.msk.f32.mxu1 %vm5091_vm9, %v5092_v30 }
 0x3cb   :  { %4687 = vmatprep.subr.bf16.mxu1 %v5090_v29 }
 0x3ce   :  { %4689 = vmatpush3.bf16.msra.mxu1 %v4688_v54 }
 0x3cf   :  { %4690 = vmatprep.subr.bf16.mxu1 %v5090_v29 }
 0x3d2   :  { %4692 = vmatpush3.bf16.msra.mxu1 %v4691_v57  ;;  %v1986_v57 = vld [vmem:[%s6400_s3 + $0x6d8] sm:$0xff] }
 0x3d3   :  { %4693 = vmatprep.subr.bf16.mxu1 %v5090_v29  ;;  %v4717_v60 = vpack.c.bf16 %v1988_v58, %v1986_v57  ;;  %v2319_v58 = vld [vmem:[%s6400_s3 + $0xa60] sm:$0xff] }
 0x3d5   :  { %4157 = vmatmul.mubr.msk.f32.vlgmr.msra.gmra.mrb[12].mxu1 %vm1257_vm11, %v1250_v50 }
 0x3d6   :  { %4167 = vmatprep.mubr.msk.f32.mxu1 %vm5091_vm9, %v5092_v30  ;;  %4695 = vmatpush3.bf16.msra.mxu1 %v4694_v61  ;;  %v1987_v61 = vld [vmem:[%s6400_s3 + $0x6e0] sm:$0xff] }
 0x3d7   :  { %4696 = vmatprep.subr.bf16.mxu1 %v5090_v29 }
 0x3da   :  { %4698 = vmatpush3.bf16.msra.mxu1 %v4697_v63  ;;  %v1992_v63 = vld [vmem:[%s6400_s3 + $0x708] sm:$0xff] }
 0x3db   :  { %4699 = vmatprep.subr.bf16.mxu1 %v5090_v29  ;;  %v4721_v1 = vpack.c.bf16 %v1992_v63, %v1990_v62  ;;  %v2133_v62 = vld [vmem:[%s6400_s3 + $0x970] sm:$0xff]  ;;  %v2321_v63 = vld [vmem:[%s6400_s3 + $0xa80] sm:$0xff] }
 0x3dd   :  { %4168 = vmatmul.mubr.msk.f32.vlgmr.msra.gmra.mrb[14].mxu1 %vm1417_vm12, %v1411_v0  ;;  %v4719_v0 = vpack.c.bf16 %v1987_v61, %v1985_v59  ;;  %v2320_v59 = vld [vmem:[%s6400_s3 + $0xa70] sm:$0xff]  ;;  %v2132_v61 = vld [vmem:[%s6400_s3 + $0x960] sm:$0xff] }
 0x3de   :  { %4176 = vmatprep.mubr.msk.f32.mxu1 %vm5091_vm9, %v5092_v30  ;;  %4701 = vmatpush3.bf16.msra.mxu1 %v4700_v3  ;;  %v1991_v3 = vld [vmem:[%s6400_s3 + $0x700] sm:$0xff] }
 0x3df   :  { %4174 = vmatprep.subr.mxu1 %v5092_v30 }
 0x3e2   :  { %4175 = vmatpush3.msra.mxu1 %v1493_v4  ;;  %v4723_v4 = vpack.c.bf16 %v1991_v3, %v1989_v2  ;;  %v1999_v3 = vlaneseq }
 0x3e3   :  { %4702 = vmatprep.subr.bf16.mxu1 %v5090_v29 }
 0x49c   :  { %v1327_v5 = vpop.f32.mrb[10].mxu1 }
 0x49d   :  { %v4143_v6 = vpop.f32.mrb[11].mxu1 }
 0x49e   :  { %v2305_v6 = vld [vmem:[%s6400_s3 + $0x980] sm:$0xff] }
 0x4a8   :  { %v1403_v7 = vpop.f32.mrb[12].mxu1 }
 0x4a9   :  { %v1407_v11 = vmax.f32 %v1327_v5, %v1403_v7  ;;  %v4158_v12 = vpop.f32.mrb[13].mxu1  ;;  %v2306_v7 = vld [vmem:[%s6400_s3 + $0x990] sm:$0xff] }
 0x4aa   :  { %v2308_v12 = vld [vmem:[%s6400_s3 + $0x9b0] sm:$0xff] }
 0x4ab   :  { %v1409_v15 = vadd.f32 %v1408_v10, %v1407_v11  ;;  %v4780_v10 = vpack.c.bf16 %v2306_v7, %v2305_v6  ;;  %v2307_v11 = vld [vmem:[%s6400_s3 + $0x9a0] sm:$0xff]  ;;  %v3563_v6 = vld [vmem:[%s6400_s3 + $0x710] ss:$8 sm:$0x3] }
 0x4ac   :  { %v4783_v13 = vpack.c.bf16 %v2308_v12, %v2307_v11 }
 0x4ad   :  { %v1410_v17 = vmax.f32 %v1409_v15, 0.0  ;;  %4781 = vmatpush1.bf16.msra.mxu0 %v4780_v10  ;;  %v2310_v15 = vld [vmem:[%s6400_s3 + $0x9d0] sm:$0xff] }
 0x4ae   :  { %4782 = vmatprep.subr.bf16.mxu0 %v5090_v29 }
 0x4af   :  { %4177 = vmatmul.mubr.msk.f32.vlgmr.msra.gmra.mrb[14].mxu1 %vm1494_vm13, %v1410_v17  ;;  %v1572_v22 = vrot.slane %v1410_v17, 1  ;;  %v1649_v27 = vrot.slane %v1410_v17, 2  ;;  %v1726_v34 = vrot.slane %v1410_v17, 3  ;;  %v1803_v39 = vrot.slane %v1410_v17, 4 }
 0x4b0   :  { %4704 = vmatpush3.bf16.msra.mxu1 %v4703_v16  ;;  %4185 = vmatprep.mubr.msk.f32.mxu1 %vm5091_vm9, %v5092_v30  ;;  %v1880_v8 = vrot.slane %v1410_v17, 5  ;;  %v4786_v17 = vpack.c.bf16 %v2310_v15, %v2309_v14  ;;  %v2090_v15 = vld [vmem:[%s6400_s3 + $0x720] sm:$0xff] }
 0x4b1   :  { %4183 = vmatprep.subr.mxu1 %v5092_v30  ;;  %4784 = vmatpush1.bf16.msra.mxu0 %v4783_v13 }
 0x4b2   :  { %4785 = vmatprep.subr.bf16.mxu0 %v5090_v29 }
 0x4b4   :  { %4184 = vmatpush3.msra.mxu1 %v1571_v18 }
 0x4b5   :  { %4705 = vmatprep.subr.bf16.mxu1 %v5090_v29  ;;  %4787 = vmatpush1.bf16.msra.mxu0 %v4786_v17 }
 0x4b6   :  { %4788 = vmatprep.subr.bf16.mxu0 %v5090_v29 }
 0x4b7   :  { %4186 = vmatmul.mubr.msk.f32.vlgmr.msra.gmra.mrb[14].mxu1 %vm1494_vm13, %v1572_v22  ;;  %v4789_v22 = vpack.c.bf16 %v2312_v20, %v2311_v19  ;;  %v2091_v19 = vld [vmem:[%s6400_s3 + $0x728] sm:$0xff]  ;;  %v2093_v20 = vld [vmem:[%s6400_s3 + $0x738] sm:$0xff] }
 0x4b8   :  { %4707 = vmatpush3.bf16.msra.mxu1 %v4706_v21  ;;  %4194 = vmatprep.mubr.msk.f32.mxu1 %vm5091_vm9, %v5092_v30 }
 0x4b9   :  { %4192 = vmatprep.subr.mxu1 %v5092_v30  ;;  %4790 = vmatpush1.bf16.msra.mxu0 %v4789_v22 }
 0x4ba   :  { %4791 = vmatprep.subr.bf16.mxu0 %v5090_v29 }
 0x4bc   :  { %4193 = vmatpush3.msra.mxu1 %v1648_v23  ;;  %v2313_v23 = vld [vmem:[%s6400_s3 + $0xa00] sm:$0xff] }
 0x4bd   :  { %4708 = vmatprep.subr.bf16.mxu1 %v5090_v29  ;;  %v4792_v25 = vpack.c.bf16 %v2314_v24, %v2313_v23 }
 0x4bf   :  { %4195 = vmatmul.mubr.msk.f32.vlgmr.msra.gmra.mrb[14].mxu1 %vm1494_vm13, %v1649_v27  ;;  %4793 = vmatpush1.bf16.msra.mxu0 %v4792_v25  ;;  %v2316_v27 = vld [vmem:[%s6400_s3 + $0xa30] sm:$0xff] }
 0x4c0   :  { %4710 = vmatpush3.bf16.msra.mxu1 %v4709_v26  ;;  %4203 = vmatprep.mubr.msk.f32.mxu1 %vm5091_vm9, %v5092_v30  ;;  %v2315_v26 = vld [vmem:[%s6400_s3 + $0xa20] sm:$0xff] }
 0x4c1   :  { %4201 = vmatprep.subr.mxu1 %v5092_v30  ;;  %4794 = vmatprep.subr.bf16.mxu0 %v5090_v29 }
 0x4c4   :  { %4202 = vmatpush3.msra.mxu1 %v1725_v28  ;;  %v4795_v28 = vpack.c.bf16 %v2316_v27, %v2315_v26  ;;  %v2098_v26 = vld [vmem:[%s6400_s3 + $0x740] sm:$0xff]  ;;  %v2099_v27 = vld [vmem:[%s6400_s3 + $0x750] sm:$0xff] }
 0x4c5   :  { %4711 = vmatprep.subr.bf16.mxu1 %v5090_v29 }
 0x4c6   :  { %4796 = vmatpush1.bf16.msra.mxu0 %v4795_v28 }
 0x4c7   :  { %4204 = vmatmul.mubr.msk.f32.vlgmr.msra.gmra.mrb[14].mxu1 %vm1494_vm13, %v1726_v34  ;;  %4797 = vmatprep.subr.bf16.mxu0 %v5090_v29  ;;  %v2118_v34 = vld [vmem:[%s6400_s3 + $0x880] sm:$0xff] }
 0x4c8   :  { %4713 = vmatpush3.bf16.msra.mxu1 %v4712_v33  ;;  %4212 = vmatprep.mubr.msk.f32.mxu1 %vm5091_vm9, %v5092_v30  ;;  %v4726_v33 = vpack.c.bf16 %v2117_v32, %v2116_v31 }
 0x4c9   :  { %4210 = vmatprep.subr.mxu1 %v5092_v30 }
 0x4cc   :  { %4211 = vmatpush3.msra.mxu1 %v1802_v35  ;;  %v2119_v35 = vld [vmem:[%s6400_s3 + $0x890] sm:$0xff] }
 0x4cd   :  { %4714 = vmatprep.subr.bf16.mxu1 %v5090_v29  ;;  %v4729_v37 = vpack.c.bf16 %v2119_v35, %v2118_v34 }
 0x4cf   :  { %4213 = vmatmul.mubr.msk.f32.vlgmr.msra.gmra.mrb[14].mxu1 %vm1494_vm13, %v1803_v39  ;;  %v2121_v39 = vld [vmem:[%s6400_s3 + $0x8b0] sm:$0xff] }
 0x4d0   :  { %4716 = vmatpush3.bf16.msra.mxu1 %v4715_v38  ;;  %4221 = vmatprep.mubr.msk.f32.mxu1 %vm5091_vm9, %v5092_v30  ;;  %v2120_v38 = vld [vmem:[%s6400_s3 + $0x8a0] sm:$0xff] }
 0x4d1   :  { %4219 = vmatprep.subr.mxu1 %v5092_v30 }
 0x4d4   :  { %4220 = vmatpush3.msra.mxu1 %v1879_v40  ;;  %v4732_v40 = vpack.c.bf16 %v2121_v39, %v2120_v38  ;;  %v4753_v38 = vpack.c.bf16 %v2099_v27, %v2098_v26 }
 0x4d5   :  { %4718 = vmatprep.subr.bf16.mxu1 %v4717_v60  ;;  %v4801_v60 = vpack.c.bf16 %v2320_v59, %v2319_v58  ;;  %v2111_v58 = vld [vmem:[%s6400_s3 + $0x810] sm:$0xff] }
 0x4d7   :  { %4222 = vmatmul.mubr.msk.f32.vlgmr.msra.gmra.mrb[14].mxu1 %vm1494_vm13, %v1880_v8  ;;  %v2122_v8 = vld [vmem:[%s6400_s3 + $0x8c0] sm:$0xff] }
 0x4d8   :  { %2075 = vmatprep.mubr.f32.mxu1 %v5092_v30  ;;  %4720 = vmatpush1.bf16.msra.mxu1 %v4719_v0  ;;  %v4750_v0 = vpack.c.bf16 %v2133_v62, %v2132_v61  ;;  %v2113_v61 = vld [vmem:[%s6400_s3 + $0x830] sm:$0xff] }
 0x4d9   :  { %4722 = vmatprep.subr.bf16.mxu1 %v4721_v1  ;;  %v2322_v1 = vld [vmem:[%s6400_s3 + $0xa90] sm:$0xff] }
 0x4da   :  { %v4804_v2 = vpack.c.bf16 %v2322_v1, %v2321_v63  ;;  %v2114_v63 = vld [vmem:[%s6400_s3 + $0x840] sm:$0xff] }
 0x4dc   :  { %4724 = vmatpush1.bf16.msra.mxu1 %v4723_v4  ;;  %v2000_v4 = vshrl.u32 %v1999_v3, 7 }
 0x4dd   :  { %4725 = vmatprep.subr.bf16.mxu1 %v5090_v29 }
 0x4de   :  { %v2005_v7 = vsub.s32 1, %v2000_v4 }
 0x4e0   :  { %v2006_v11 = vrot.slane %v3563_v6, %v2005_v7 }
 0x5aa   :  { %v1949_v42 = vpop.f32.mrb[14].mxu1 }
 0x5ab   :  { %v5015_v43 = vadd.f32 %v1949_v42, %v1416_v41  ;;  %v4223_v44 = vpop.f32.mrb[15].mxu1  ;;  %v2123_v41 = vld [vmem:[%s6400_s3 + $0x8d0] sm:$0xff] }
 0x5ac   :  { %v4735_v42 = vpack.c.bf16 %v2123_v41, %v2122_v8  ;;  %v2125_v44 = vld [vmem:[%s6400_s3 + $0x8f0] sm:$0xff]  ;;  %v2100_v8 = vld [vmem:[%s6400_s3 + $0x760] sm:$0xff] }
 0x5ad   :  { %5075 = vtanh.f32 %v5015_v43  ;;  %v1954_v47 = vmul.f32 0.5, %v5015_v43  ;;  %v2124_v43 = vld [vmem:[%s6400_s3 + $0x8e0] sm:$0xff]  ;;  %v2101_v41 = vld [vmem:[%s6400_s3 + $0x770] sm:$0xff] }
 0x5af   :  { %5077 = vtanh.f32 %v1954_v47  ;;  %v2127_v47 = vld [vmem:[%s6400_s3 + $0x910] sm:$0xff] }
 0x5b7   :  { %v5076_v45 = vpop.eup %5075 }
 0x5b8   :  { %1970 = vrot.lane.b32.xlu0 %v5076_v45, %s5093_s25  ;;  %v4738_v45 = vpack.c.bf16 %v2125_v44, %v2124_v43  ;;  %v4756_v44 = vpack.c.bf16 %v2101_v41, %v2100_v8  ;;  %v2543_v8 = vld [vmem:[%s6400_s3 + $0xc40] sm:$0xff] }
 0x5b9   :  { %v5078_v48 = vpop.eup %5077 }
 0x5ba   :  { %v1956_v49 = vadd.f32 1.0, %v5078_v48 }
 0x5bc   :  { %1965 = vrot.lane.b32.xlu0 %v3562_v46, %s5094_s28  ;;  %v1957_v50 = vmul.f32 0.5, %v1956_v49  ;;  %v2126_v46 = vld [vmem:[%s6400_s3 + $0x900] sm:$0xff] }
 0x5bd   :  { %v4741_v48 = vpack.c.bf16 %v2127_v47, %v2126_v46  ;;  %v2128_v49 = vld [vmem:[%s6400_s3 + $0x920] sm:$0xff]  ;;  %v2103_v46 = vld [vmem:[%s6400_s3 + $0x790] sm:$0xff] }
 0x62a   :  { %v1971_v51 = vpop.permute.xlu0 %1970 }
 0x62b   :  { %v1973_v52 = vmul.f32 %v1971_v51, %v1957_v50 }
 0x62d   :  { %1975 = vrot.lane.b32.xlu1 %v1973_v52, %s5094_s28  ;;  %v2317_v52 = vld [vmem:[%s6400_s3 + $0xa40] sm:$0xff] }
 0x62e   :  { %v1966_v53 = vpop.permute.xlu0 %1965 }
 0x62f   :  { %v1968_v54 = vmul.f32 %v1966_v53, %v1957_v50  ;;  %v2318_v53 = vld [vmem:[%s6400_s3 + $0xa50] sm:$0xff] }
 0x69f   :  { %v1976_v55 = vpop.permute.xlu1 %1975 }
 0x6a0   :  { %v1978_v56 = vadd.f32 %v1976_v55, %v1968_v54  ;;  %v4798_v54 = vpack.c.bf16 %v2318_v53, %v2317_v52  ;;  %v2130_v55 = vld [vmem:[%s6400_s3 + $0x940] sm:$0xff]  ;;  %v2107_v52 = vld [vmem:[%s6400_s3 + $0x7d0] sm:$0xff] }
 0x6a2   :  { %5079 = vtanh.f32 %v1978_v56  ;;  %4799 = vmatpush1.bf16.msra.mxu0 %v4798_v54  ;;  %v2108_v54 = vld [vmem:[%s6400_s3 + $0x7e0] sm:$0xff] }
 0x6a3   :  { %4800 = vmatprep.subr.bf16.mxu0 %v5090_v29 }
 0x6a6   :  { %4802 = vmatpush1.bf16.msra.mxu0 %v4801_v60  ;;  %v2112_v60 = vld [vmem:[%s6400_s3 + $0x820] sm:$0xff] }
 0x6a7   :  { %4803 = vmatprep.subr.bf16.mxu0 %v5090_v29  ;;  %v4774_v62 = vpack.c.bf16 %v2113_v61, %v2112_v60 }
 0x6aa   :  { %4805 = vmatpush1.bf16.msra.mxu0 %v4804_v2  ;;  %v2417_v2 = vld [vmem:[%s6400_s3 + $0xab0] sm:$0xff] }
 0x6ab   :  { %4896 = vmatprep.subr.bf16.mxu0 %v5090_v29 }
 0x6ac   :  { %v5080_v5 = vpop.eup %5079 }
 0x6ad   :  { %1981 = vrot.lane.b32.xlu1 %v5080_v5, %s5093_s25  ;;  %v2001_v5 = vsub.s32 0, %v2000_v4 }
 0x6af   :  { %v2002_v10 = vrot.slane %v3563_v6, %v2001_v5 }
 0x6b1   :  { %3499 = vrot.lane.b32.xlu1 %v1978_v56, %s5095_s18  ;;  %v2131_v56 = vld [vmem:[%s6400_s3 + $0x950] sm:$0xff] }
 0x6b2   :  { %v4747_v57 = vpack.c.bf16 %v2131_v56, %v2130_v55  ;;  %v2109_v55 = vld [vmem:[%s6400_s3 + $0x7f0] sm:$0xff] }
 0x6b3   :  { %v4768_v56 = vpack.c.bf16 %v2109_v55, %v2108_v54 }
 0x71f   :  { %v1982_v16 = vpop.permute.xlu1 %1981 }
 0x720   :  { %v1984_v18 = vmul.f32 %v1982_v16, %v1957_v50  ;;  %v2129_v50 = vld [vmem:[%s6400_s3 + $0x930] sm:$0xff] }
 0x721   :  { %v4744_v51 = vpack.c.bf16 %v2129_v50, %v2128_v49  ;;  %v2092_v16 = vld [vmem:[%s6400_s3 + $0x730] sm:$0xff] }
 0x722   :  { %1996 = vrot.lane.b32.xlu0 %v1984_v18, %s5094_s28  ;;  %v2105_v49 = vld [vmem:[%s6400_s3 + $0x7b0] sm:$0xff] }
 0x723   :  { %v3500_v21 = vpop.permute.xlu1 %3499 }
 0x724   :  { %3502 = vst.msk [vmem:[%s6404_s4 + $0x1f] sm:$0x1] %vm3496_vm14, %v3500_v21 }
 0x794   :  { %v1997_v36 = vpop.permute.xlu0 %1996 }
 0x795   :  { %3497 = vst.msk [vmem:[%s6404_s4 + $0x1e] sm:$0x1] %vm3496_vm14, %v1997_v36  ;;  %3564 = vmatmul.mubr.msk.f32.vlgmr.msra.gmra.mrb[16].mxu1 %vm1417_vm12, %v1997_v36 }
 0x796   :  { %4727 = vmatpush1.bf16.msra.mxu1 %v4726_v33 }
 0x797   :  { %4728 = vmatprep.subr.bf16.mxu1 %v5090_v29 }
 0x79a   :  { %4730 = vmatpush1.bf16.msra.mxu1 %v4729_v37 }
 0x79b   :  { %4731 = vmatprep.subr.bf16.mxu1 %v5090_v29 }
 0x79e   :  { %4733 = vmatpush1.bf16.msra.mxu1 %v4732_v40 }
 0x79f   :  { %4734 = vmatprep.subr.bf16.mxu1 %v5090_v29 }
 0x7a2   :  { %4736 = vmatpush1.bf16.msra.mxu1 %v4735_v42 }
 0x7a3   :  { %4737 = vmatprep.subr.bf16.mxu1 %v5090_v29 }
 0x7a6   :  { %4739 = vmatpush1.bf16.msra.mxu1 %v4738_v45  ;;  %v2102_v45 = vld [vmem:[%s6400_s3 + $0x780] sm:$0xff] }
 0x7a7   :  { %4740 = vmatprep.subr.bf16.mxu1 %v5090_v29  ;;  %v4759_v47 = vpack.c.bf16 %v2103_v46, %v2102_v45  ;;  %v2546_v45 = vld [vmem:[%s6400_s3 + $0xc70] sm:$0xff]  ;;  %v2547_v46 = vld [vmem:[%s6400_s3 + $0xc80] sm:$0xff] }
 0x7aa   :  { %4742 = vmatpush1.bf16.msra.mxu1 %v4741_v48  ;;  %v2104_v48 = vld [vmem:[%s6400_s3 + $0x7a0] sm:$0xff] }
 0x7ab   :  { %4743 = vmatprep.subr.bf16.mxu1 %v5090_v29  ;;  %v4762_v50 = vpack.c.bf16 %v2105_v49, %v2104_v48  ;;  %v2548_v48 = vld [vmem:[%s6400_s3 + $0xc90] sm:$0xff]  ;;  %v2549_v49 = vld [vmem:[%s6400_s3 + $0xca0] sm:$0xff] }
 0x7ae   :  { %4745 = vmatpush1.bf16.msra.mxu1 %v4744_v51  ;;  %v2106_v51 = vld [vmem:[%s6400_s3 + $0x7c0] sm:$0xff] }
 0x7af   :  { %4746 = vmatprep.subr.bf16.mxu1 %v5090_v29  ;;  %v4765_v53 = vpack.c.bf16 %v2107_v52, %v2106_v51  ;;  %v2522_v51 = vld [vmem:[%s6400_s3 + $0xaf0] sm:$0xff]  ;;  %v2523_v52 = vld [vmem:[%s6400_s3 + $0xb00] sm:$0xff] }
 0x7b2   :  { %4748 = vmatpush1.bf16.msra.mxu1 %v4747_v57  ;;  %v2110_v57 = vld [vmem:[%s6400_s3 + $0x800] sm:$0xff] }
 0x7b3   :  { %4749 = vmatprep.subr.bf16.mxu1 %v5090_v29  ;;  %v4771_v59 = vpack.c.bf16 %v2111_v58, %v2110_v57 }
 0x7b6   :  { %4751 = vmatpush1.bf16.msra.mxu1 %v4750_v0  ;;  %v2115_v0 = vld [vmem:[%s6400_s3 + $0x850] sm:$0xff] }
 0x7b7   :  { %4752 = vmatprep.subr.bf16.mxu1 %v5090_v29  ;;  %v4777_v1 = vpack.c.bf16 %v2115_v0, %v2114_v63  ;;  %v2525_v63 = vld [vmem:[%s6400_s3 + $0xb20] sm:$0xff] }
 0x868   :  { %v2077_v12 = vpop.f32.mrb[16].mxu1 }
 0x869   :  { %v2078_v13 = vadd.f32 %v2077_v12, %v2002_v10  ;;  %v2079_v14 = vpop.f32.mrb[17].mxu1 }
 0x86a   :  { %v2080_v17 = vadd.f32 %v2079_v14, %v2006_v11 }
 0x86b   :  { %v2085_v18 = vrot.slane %v2078_v13, %v2001_v5 }
 0x86c   :  { %v2089_v21 = vrot.slane %v2080_v17, %v2001_v5  ;;  %v2412_v17 = vld [vmem:[%s6400_s3 + $0xaa0] ss:$0 sm:$0xff] }
 0x86d   :  { %v5818_v22 = vmul.f32 %v2090_v15, %v2085_v18  ;;  %v5820_v23 = vmul.f32 %v2092_v16, %v2085_v18 }
 0x86e   :  { %v2095_v24 = vmul.f32 %v2091_v19, %v2089_v21  ;;  %v5822_v25 = vmul.f32 %v2093_v20, %v2089_v21 }
 0x86f   :  { %v2138_v28 = vrot.slane %v5818_v22, 1  ;;  %v2139_v31 = vrot.slane %v5820_v23, 1  ;;  %v2323_v32 = vrot.slane %v5818_v22, 2  ;;  %v2324_v33 = vrot.slane %v5820_v23, 2 }
 0x870   :  { %v2141_v34 = vrot.slane %v2095_v24, 1  ;;  %v2142_v35 = vrot.slane %v5822_v25, 1  ;;  %v2326_v36 = vrot.slane %v2095_v24, 2  ;;  %v2327_v37 = vrot.slane %v5822_v25, 2 }
 0x871   :  { %v2140_v42 = vsel %vm33_vm3, %v2138_v28, %v2139_v31  ;;  %v2325_v43 = vsel %vm50_vm0, %v2323_v32, %v2324_v33  ;;  %v2538_v32 = vld [vmem:[%s6400_s3 + $0xbf0] sm:$0xff] }
 0x872   :  { %v2143_v39 = vsel %vm33_vm3, %v2141_v34, %v2142_v35  ;;  %v2328_v40 = vsel %vm50_vm0, %v2326_v36, %v2327_v37  ;;  %v2418_v34 = vld [vmem:[%s6400_s3 + $0xac0] sm:$0xff] }
 0x873   :  { %3565 = vmatprep.mubr.msk.f32.mxu1 %vm2146_vm15, %v2143_v39  ;;  %3569 = vmatprep.mubr.msk.f32.mxu0 %vm2146_vm15, %v2328_v40  ;;  %v2542_v40 = vld [vmem:[%s6400_s3 + $0xc30] sm:$0xff] }
 0x874   :  { %2216 = vmatmul.mubr.f32.vlgmr.msra.gmra.mrb[18].mxu1 %v2140_v42  ;;  %2400 = vmatmul.mubr.f32.vlgmr.msra.gmra.mrb[8].mxu0 %v2325_v43  ;;  %v4824_v41 = vpack.c.bf16 %v2543_v8, %v2542_v40  ;;  %v2544_v42 = vld [vmem:[%s6400_s3 + $0xc50] sm:$0xff]  ;;  %v2545_v43 = vld [vmem:[%s6400_s3 + $0xc60] sm:$0xff] }
 0x875   :  { %4754 = vmatpush1.bf16.msra.mxu1 %v4753_v38  ;;  %3566 = vmatprep.mubr.msk.f32.mxu1 %vm2146_vm15, %v2142_v35  ;;  %v2419_v35 = vld [vmem:[%s6400_s3 + $0xad0] sm:$0xff]  ;;  %v2541_v38 = vld [vmem:[%s6400_s3 + $0xc20] sm:$0xff] }
 0x876   :  { %3570 = vmatprep.mubr.msk.f32.mxu0 %vm2146_vm15, %v2327_v37  ;;  %4755 = vmatprep.subr.bf16.mxu1 %v5090_v29  ;;  %v2540_v37 = vld [vmem:[%s6400_s3 + $0xc10] sm:$0xff] }
 0x877   :  { %v4820_v39 = vpack.c.bf16 %v2541_v38, %v2540_v37  ;;  %v2752_v37 = vld [vmem:[%s6400_s3 + $0xd00] sm:$0xff]  ;;  %v2755_v8 = vld [vmem:[%s6400_s3 + $0xd30] sm:$0xff] }
 0x878   :  { %2221 = vmatmul.mubr.f32.gmra.mrb[20].mxu1 %v2139_v31  ;;  %2405 = vmatmul.mubr.f32.gmra.mrb[10].mxu0 %v2324_v33  ;;  %v2539_v33 = vld [vmem:[%s6400_s3 + $0xc00] sm:$0xff] }
 0x879   :  { %4757 = vmatpush1.bf16.msra.mxu1 %v4756_v44  ;;  %3567 = vmatprep.mubr.msk.f32.mxu1 %vm2146_vm15, %v2095_v24  ;;  %v2536_v24 = vld [vmem:[%s6400_s3 + $0xbd0] sm:$0xff]  ;;  %v4816_v36 = vpack.c.bf16 %v2539_v33, %v2538_v32  ;;  %v4828_v44 = vpack.c.bf16 %v2545_v43, %v2544_v42 }
 0x87a   :  { %4758 = vmatprep.subr.bf16.mxu1 %v5090_v29  ;;  %4344 = vmatprep.mubr.msk.f32.mxu0 %vm5091_vm9, %v5092_v30  ;;  %v2749_v33 = vld [vmem:[%s6400_s3 + $0xcd0] sm:$0xff] }
 0x87b   :  { %v2757_v43 = vld [vmem:[%s6400_s3 + $0xd50] sm:$0xff] }
 0x87d   :  { %4760 = vmatpush1.bf16.msra.mxu1 %v4759_v47  ;;  %v4832_v47 = vpack.c.bf16 %v2547_v46, %v2546_v45  ;;  %v2759_v46 = vld [vmem:[%s6400_s3 + $0xd70] sm:$0xff] }
 0x87e   :  { %4761 = vmatprep.subr.bf16.mxu1 %v5090_v29 }
 0x881   :  { %4763 = vmatpush1.bf16.msra.mxu1 %v4762_v50  ;;  %v4836_v50 = vpack.c.bf16 %v2549_v49, %v2548_v48  ;;  %v2865_v49 = vld [vmem:[%s6400_s3 + $0xd90] ss:$0 sm:$0xff] }
 0x882   :  { %4764 = vmatprep.subr.bf16.mxu1 %v5090_v29 }
 0x885   :  { %4766 = vmatpush1.bf16.msra.mxu1 %v4765_v53  ;;  %v4840_v53 = vpack.c.bf16 %v2523_v52, %v2522_v51 }
 0x886   :  { %4767 = vmatprep.subr.bf16.mxu1 %v5090_v29 }
 0x889   :  { %4769 = vmatpush1.bf16.msra.mxu1 %v4768_v56 }
 0x88a   :  { %4770 = vmatprep.subr.bf16.mxu1 %v5090_v29 }
 0x88d   :  { %4772 = vmatpush1.bf16.msra.mxu1 %v4771_v59 }
 0x88e   :  { %4773 = vmatprep.subr.bf16.mxu1 %v5090_v29 }
 0x891   :  { %4775 = vmatpush1.bf16.msra.mxu1 %v4774_v62  ;;  %v2524_v62 = vld [vmem:[%s6400_s3 + $0xb10] sm:$0xff] }
 0x892   :  { %4776 = vmatprep.subr.bf16.mxu1 %v5090_v29 }
 0x895   :  { %4778 = vmatpush1.bf16.msra.mxu1 %v4777_v1 }
 0x898   :  { %2295 = vmatmul.mubr.f32.vlgmr.msra.gmra.mrb[22].mxu1 %v5818_v22 }
 0x899   :  { %3568 = vmatprep.mubr.msk.f32.mxu1 %vm2146_vm15, %v5822_v25  ;;  %v2537_v25 = vld [vmem:[%s6400_s3 + $0xbe0] sm:$0xff] }
 0x89a   :  { %v4812_v31 = vpack.c.bf16 %v2537_v25, %v2536_v24  ;;  %v2534_v25 = vld [vmem:[%s6400_s3 + $0xbb0] sm:$0xff] }
 0x89c   :  { %2300 = vmatmul.mubr.f32.gmra.mrb[24].mxu1 %v5820_v23 }
 0x89d   :  { %4228 = vmatprep.mubr.msk.f32.mxu1 %vm2421_vm4, %v2417_v2 }
 0x947   :  { %v2217_v3 = vpop.f32.mrb[18].mxu1  ;;  %v2401_v4 = vpop.f32.mrb[8].mxu0 }
 0x948   :  { %v2219_v5 = vpop.f32.mrb[19].mxu1  ;;  %v2403_v6 = vpop.f32.mrb[9].mxu0 }
 0x949   :  { %v4844_v6 = vpack.c.bf16 %v2525_v63, %v2524_v62  ;;  %v3005_v62 = vld [vmem:[%s6400_s3 + $0xef0] sm:$0xff] }
 0x94b   :  { %v2222_v7 = vpop.f32.mrb[20].mxu1  ;;  %v2406_v10 = vpop.f32.mrb[10].mxu0 }
 0x94c   :  { %v2224_v11 = vpop.f32.mrb[21].mxu1  ;;  %v2408_v12 = vpop.f32.mrb[11].mxu0 }
 0x94d   :  { %v2526_v12 = vld [vmem:[%s6400_s3 + $0xb30] sm:$0xff] }
 0x96b   :  { %v2296_v13 = vpop.f32.mrb[22].mxu1 }
 0x96c   :  { %v2297_v14 = vadd.f32 %v2296_v13, %v2217_v3  ;;  %v2298_v15 = vpop.f32.mrb[23].mxu1  ;;  %v2527_v13 = vld [vmem:[%s6400_s3 + $0xb40] sm:$0xff] }
 0x96d   :  { %v4848_v15 = vpack.c.bf16 %v2527_v13, %v2526_v12  ;;  %v3010_v12 = vld [vmem:[%s6400_s3 + $0xf40] sm:$0xff]  ;;  %v3011_v13 = vld [vmem:[%s6400_s3 + $0xf50] sm:$0xff] }
 0x96e   :  { %v2410_v16 = vadd.f32 %v2401_v4, %v2297_v14 }
 0x96f   :  { %v2301_v18 = vpop.f32.mrb[24].mxu1 }
 0x970   :  { %v2302_v19 = vadd.f32 %v2301_v18, %v2222_v7  ;;  %v2303_v20 = vpop.f32.mrb[25].mxu1  ;;  %v2413_v21 = vadd.f32 %v2412_v17, %v2410_v16  ;;  %v2528_v16 = vld [vmem:[%s6400_s3 + $0xb50] sm:$0xff] }
 0x971   :  { %v2531_v20 = vld [vmem:[%s6400_s3 + $0xb80] sm:$0xff] }
 0x972   :  { %v2411_v22 = vadd.f32 %v2406_v10, %v2302_v19  ;;  %v2415_v26 = vmax.f32 %v2413_v21, 0.0  ;;  %v2530_v19 = vld [vmem:[%s6400_s3 + $0xb70] sm:$0xff] }
 0x973   :  { %v4856_v21 = vpack.c.bf16 %v2531_v20, %v2530_v19  ;;  %v3014_v20 = vld [vmem:[%s6400_s3 + $0xf80] sm:$0xff] }
 0x974   :  { %v2414_v23 = vadd.f32 %v2412_v17, %v2411_v22  ;;  %v2529_v17 = vld [vmem:[%s6400_s3 + $0xb60] sm:$0xff]  ;;  %v2532_v22 = vld [vmem:[%s6400_s3 + $0xb90] sm:$0xff] }
 0x975   :  { %v4852_v18 = vpack.c.bf16 %v2529_v17, %v2528_v16  ;;  %v3012_v16 = vld [vmem:[%s6400_s3 + $0xf60] sm:$0xff]  ;;  %v3013_v17 = vld [vmem:[%s6400_s3 + $0xf70] sm:$0xff] }
 0x976   :  { %v2416_v27 = vmax.f32 %v2414_v23, 0.0  ;;  %v2533_v23 = vld [vmem:[%s6400_s3 + $0xba0] sm:$0xff]  ;;  %v4919_v19 = vpack.c.bf16 %v3013_v17, %v3012_v16 }
 0x977   :  { %v4860_v24 = vpack.c.bf16 %v2533_v23, %v2532_v22  ;;  %v2878_v22 = vld [vmem:[%s6400_s3 + $0xde0] sm:$0x1] }
 0x978   :  { %v4806_v28 = vpack.c.bf16 %v2416_v27, %v2415_v26  ;;  %v2535_v26 = vld [vmem:[%s6400_s3 + $0xbc0] sm:$0xff] }
 0x979   :  { %v4864_v27 = vpack.c.bf16 %v2535_v26, %v2534_v25  ;;  %v3018_v26 = vld [vmem:[%s6400_s3 + $0xfc0] sm:$0xf] }
 0x97a   :  { %4808 = vmatprep.subr.msk.bf16.mxu1 %vm5141_vm2, %v4806_v28  ;;  %v3002_v16 = vld [vmem:[%s6400_s3 + $0xec0] sm:$0xff] }
 0x97b   :  { %4811 = vmatpush3.bf16.msk.msra.mxu1 %vm5141_vm2, %v4806_v28  ;;  %v2747_v28 = vld [vmem:[%s6400_s3 + $0xcb0] sm:$0xff]  ;;  %vm2895_vm2 = vcmask 1044480  }
 0x97c   :  { %4813 = vmatprep.subr.bf16.mxu1 %v4812_v31  ;;  %vm4901_vm5 = vmpackc.low %vm2895_vm2, %vm5089_vm1  ;;  %vm3030_vm1 = vcmask 949248  }
 0x97e   :  { %4229 = vmatmul.mubr.msk.f32.vlgmr.msra.gmra.mrb[26].mxu1 %vm2421_vm4, %v2418_v34  ;;  %v2750_v34 = vld [vmem:[%s6400_s3 + $0xce0] sm:$0xff] }
 0x97f   :  { %4231 = vmatprep.mubr.msk.f32.mxu1 %vm2421_vm4, %v2419_v35  ;;  %4815 = vmatpush3.bf16.msra.mxu1 %v4812_v31  ;;  %v2748_v31 = vld [vmem:[%s6400_s3 + $0xcc0] sm:$0xff]  ;;  %v4872_v35 = vpack.c.bf16 %v2750_v34, %v2749_v33 }
 0x980   :  { %4817 = vmatprep.subr.bf16.mxu1 %v4816_v36  ;;  %v4868_v32 = vpack.c.bf16 %v2748_v31, %v2747_v28  ;;  %v2990_v28 = vld [vmem:[%s6400_s3 + $0xe00] sm:$0xff] }
 0x982   :  { %4232 = vmatmul.mubr.msk.f32.gmra.mrb[28].mxu1 %vm2421_vm4, %v2420_v9  ;;  %v2753_v9 = vld [vmem:[%s6400_s3 + $0xd10] sm:$0xff] }
 0x983   :  { %4819 = vmatpush3.bf16.msra.mxu1 %v4816_v36  ;;  %v2751_v36 = vld [vmem:[%s6400_s3 + $0xcf0] sm:$0xff] }
 0x984   :  { %4821 = vmatprep.subr.bf16.mxu1 %v4820_v39  ;;  %v4876_v38 = vpack.c.bf16 %v2752_v37, %v2751_v36 }
 0x987   :  { %4823 = vmatpush3.bf16.msra.mxu1 %v4820_v39  ;;  %v2754_v39 = vld [vmem:[%s6400_s3 + $0xd20] sm:$0xff] }
 0x988   :  { %4825 = vmatprep.subr.bf16.mxu1 %v4824_v41  ;;  %v4880_v40 = vpack.c.bf16 %v2754_v39, %v2753_v9 }
 0x98b   :  { %4827 = vmatpush3.bf16.msra.mxu1 %v4824_v41  ;;  %v2756_v41 = vld [vmem:[%s6400_s3 + $0xd40] sm:$0xff] }
 0x98c   :  { %4829 = vmatprep.subr.bf16.mxu1 %v4828_v44  ;;  %v4884_v42 = vpack.c.bf16 %v2756_v41, %v2755_v8  ;;  %v2991_v41 = vld [vmem:[%s6400_s3 + $0xe10] sm:$0xff] }
 0x98f   :  { %4831 = vmatpush3.bf16.msra.mxu1 %v4828_v44  ;;  %v2758_v44 = vld [vmem:[%s6400_s3 + $0xd60] sm:$0xff] }
 0x990   :  { %4833 = vmatprep.subr.bf16.mxu1 %v4832_v47  ;;  %v4888_v45 = vpack.c.bf16 %v2758_v44, %v2757_v43 }
 0x993   :  { %4835 = vmatpush3.bf16.msra.mxu1 %v4832_v47  ;;  %v2760_v47 = vld [vmem:[%s6400_s3 + $0xd80] sm:$0xff] }
 0x994   :  { %4837 = vmatprep.subr.bf16.mxu1 %v4836_v50  ;;  %v4892_v48 = vpack.c.bf16 %v2760_v47, %v2759_v46 }
 0x997   :  { %4839 = vmatpush3.bf16.msra.mxu1 %v4836_v50 }
 0x998   :  { %4841 = vmatprep.subr.bf16.mxu1 %v4840_v53 }
 0xa51   :  { %v5978_v54 = vpop.f32.mrb[26].mxu1 }
 0xa52   :  { %v2555_v55 = vrot.slane %v5978_v54, 1  ;;  %v2762_v56 = vrot.slane %v5978_v54, 2  ;;  %v2503_v57 = vpop.f32.mrb[27].mxu1 }
 0xa53   :  { %v2554_v58 = vrot.slane %v2503_v57, 1  ;;  %v2761_v59 = vrot.slane %v2503_v57, 2 }
 0xa55   :  { %v5982_v60 = vpop.f32.mrb[28].mxu1  ;;  %v2556_v61 = vsel %vm33_vm3, %v2554_v58, %v2555_v55  ;;  %v2763_v0 = vsel %vm50_vm0, %v2761_v59, %v2762_v56 }
 0xa56   :  { %v2559_v1 = vrot.slane %v5982_v60, 1  ;;  %v2766_v2 = vrot.slane %v5982_v60, 2  ;;  %v2513_v3 = vpop.f32.mrb[29].mxu1  ;;  %4262 = vmatprep.mubr.msk.f32.mxu1 %vm841_vm8, %v2556_v61 }
 0xa57   :  { %v2557_v4 = vrot.slane %v2513_v3, 1  ;;  %v2764_v5 = vrot.slane %v2513_v3, 2 }
 0xa59   :  { %v2558_v7 = vsel %vm33_vm3, %v2555_v55, %v2557_v4  ;;  %v5997_v10 = vsel %vm50_vm0, %v2762_v56, %v2764_v5  ;;  %v2560_v11 = vsel %vm33_vm3, %v2557_v4, %v2559_v1  ;;  %v6009_v14 = vsel %vm50_vm0, %v2764_v5, %v2766_v2  ;;  %v3007_v4 = vld [vmem:[%s6400_s3 + $0xf10] sm:$0xff]  ;;  %v2874_v5 = vld [vmem:[%s6400_s3 + $0xda0] sm:$0xff] }
 0xa5a   :  { %4263 = vmatmul.mubr.msk.f32.vlgmr.msra.gmra.mrb[30].mxu1 %vm841_vm8, %v2558_v7  ;;  %v3009_v7 = vld [vmem:[%s6400_s3 + $0xf30] sm:$0xff] }
 0xa5b   :  { %4843 = vmatpush3.bf16.msra.mxu1 %v4840_v53  ;;  %4265 = vmatprep.mubr.msk.f32.mxu1 %vm841_vm8, %v2560_v11 }
 0xa5c   :  { %4845 = vmatprep.subr.bf16.mxu1 %v4844_v6 }
 0xa5e   :  { %4266 = vmatmul.mubr.msk.f32.gmra.mrb[32].mxu1 %vm841_vm8, %v2559_v1 }
 0xa5f   :  { %4847 = vmatpush3.bf16.msra.mxu1 %v4844_v6  ;;  %4296 = vmatprep.mubr.msk.f32.mxu1 %vm841_vm8, %v2503_v57  ;;  %v3008_v6 = vld [vmem:[%s6400_s3 + $0xf20] sm:$0xff] }
 0xa60   :  { %4849 = vmatprep.subr.bf16.mxu1 %v4848_v15  ;;  %v4911_v11 = vpack.c.bf16 %v3009_v7, %v3008_v6  ;;  %v2997_v6 = vld [vmem:[%s6400_s3 + $0xe70] sm:$0xff]  ;;  %v2998_v7 = vld [vmem:[%s6400_s3 + $0xe80] sm:$0xff] }
 0xa63   :  { %4851 = vmatpush3.bf16.msra.mxu1 %v4848_v15  ;;  %v4915_v15 = vpack.c.bf16 %v3011_v13, %v3010_v12  ;;  %v2999_v12 = vld [vmem:[%s6400_s3 + $0xe90] sm:$0xff]  ;;  %v3000_v13 = vld [vmem:[%s6400_s3 + $0xea0] sm:$0xff] }
 0xa64   :  { %4853 = vmatprep.subr.bf16.mxu1 %v4852_v18 }
 0xa67   :  { %4855 = vmatpush3.bf16.msra.mxu1 %v4852_v18  ;;  %v2877_v18 = vld [vmem:[%s6400_s3 + $0xdd0] sm:$0xff] }
 0xa68   :  { %4857 = vmatprep.subr.bf16.mxu1 %v4856_v21 }
 0xa6b   :  { %4859 = vmatpush3.bf16.msra.mxu1 %v4856_v21  ;;  %v3015_v21 = vld [vmem:[%s6400_s3 + $0xf90] sm:$0xff] }
 0xa6c   :  { %4861 = vmatprep.subr.bf16.mxu1 %v4860_v24  ;;  %v4923_v23 = vpack.c.bf16 %v3015_v21, %v3014_v20  ;;  %v3224_v20 = vld [vmem:[%s6400_s3 + $0xfe0] sm:$0xff]  ;;  %v3225_v21 = vld [vmem:[%s6400_s3 + $0xff0] sm:$0xff] }
 0xa6f   :  { %4863 = vmatpush3.bf16.msra.mxu1 %v4860_v24  ;;  %v3016_v24 = vld [vmem:[%s6400_s3 + $0xfa0] sm:$0xff] }
 0xa70   :  { %4865 = vmatprep.subr.bf16.mxu1 %v4864_v27 }
 0xa73   :  { %4867 = vmatpush3.bf16.msra.mxu1 %v4864_v27  ;;  %v2989_v27 = vld [vmem:[%s6400_s3 + $0xdf0] sm:$0xff] }
 0xa74   :  { %4869 = vmatprep.subr.bf16.mxu1 %v4868_v32  ;;  %v4931_v31 = vpack.c.bf16 %v2990_v28, %v2989_v27  ;;  %v3229_v27 = vld [vmem:[%s6400_s3 + $0x1030] sm:$0xff]  ;;  %v3230_v28 = vld [vmem:[%s6400_s3 + $0x1040] sm:$0xff] }
 0xa76   :  { %4297 = vmatmul.mubr.msk.f32.vlgmr.msra.gmra.mrb[30].mxu1 %vm841_vm8, %v5978_v54 }
 0xa77   :  { %4299 = vmatprep.mubr.msk.f32.mxu1 %vm841_vm8, %v2513_v3  ;;  %4871 = vmatpush3.bf16.msra.mxu1 %v4868_v32  ;;  %v3006_v3 = vld [vmem:[%s6400_s3 + $0xf00] sm:$0xff] }
 0xa78   :  { %4873 = vmatprep.subr.bf16.mxu1 %v4872_v35 }
 0xa7a   :  { %4300 = vmatmul.mubr.msk.f32.gmra.mrb[32].mxu1 %vm841_vm8, %v5982_v60  ;;  %v3004_v60 = vld [vmem:[%s6400_s3 + $0xee0] sm:$0xff] }
 0xa7b   :  { %4875 = vmatpush3.bf16.msra.mxu1 %v4872_v35  ;;  %4330 = vmatprep.mubr.msk.f32.mxu1 %vm841_vm8, %v2763_v0  ;;  %v4903_v1 = vpack.c.bf16 %v3005_v62, %v3004_v60 }
 0xa7c   :  { %4877 = vmatprep.subr.bf16.mxu1 %v4876_v38 }
 0xa7f   :  { %4879 = vmatpush3.bf16.msra.mxu1 %v4876_v38 }
 0xa80   :  { %4881 = vmatprep.subr.bf16.mxu1 %v4880_v40 }
 0xa83   :  { %4883 = vmatpush3.bf16.msra.mxu1 %v4880_v40 }
 0xa84   :  { %4885 = vmatprep.subr.bf16.mxu1 %v4884_v42 }
 0xa87   :  { %4887 = vmatpush3.bf16.msra.mxu1 %v4884_v42  ;;  %v2992_v42 = vld [vmem:[%s6400_s3 + $0xe20] sm:$0xff] }
 0xa88   :  { %4889 = vmatprep.subr.bf16.mxu1 %v4888_v45 }
 0xa8b   :  { %4891 = vmatpush3.bf16.msra.mxu1 %v4888_v45 }
 0xa8c   :  { %4893 = vmatprep.subr.bf16.mxu1 %v4892_v48 }
 0xa8f   :  { %4895 = vmatpush3.bf16.msra.mxu1 %v4892_v48 }
 0xa92   :  { %4331 = vmatmul.mubr.msk.f32.vlgmr.msra.gmra.mrb[30].mxu1 %vm841_vm8, %v5997_v10  ;;  %v2875_v10 = vld [vmem:[%s6400_s3 + $0xdb0] sm:$0xff] }
 0xa93   :  { %4333 = vmatprep.mubr.msk.f32.mxu1 %vm841_vm8, %v6009_v14  ;;  %v2876_v14 = vld [vmem:[%s6400_s3 + $0xdc0] sm:$0xff] }
 0xa96   :  { %4334 = vmatmul.mubr.msk.f32.gmra.mrb[32].mxu1 %vm841_vm8, %v2766_v2 }
 0xb65   :  { %v4332_v50 = vpop.f32.mrb[30].mxu1 }
 0xb66   :  { %v2867_v51 = vadd.f32 %v4332_v50, %v2865_v49  ;;  %v2842_v52 = vpop.f32.mrb[31].mxu1  ;;  %v4935_v50 = vpack.c.bf16 %v2992_v42, %v2991_v41  ;;  %v3346_v41 = vld [vmem:[%s6400_s3 + $0x10d0] sm:$0xff]  ;;  %v3347_v42 = vld [vmem:[%s6400_s3 + $0x10e0] sm:$0xff] }
 0xb67   :  { %v2866_v53 = vadd.f32 %v2865_v49, %v2842_v52  ;;  %v2993_v52 = vld [vmem:[%s6400_s3 + $0xe30] sm:$0xff] }
 0xb68   :  { %v2871_v54 = vmax.f32 %v2867_v51, 0.0 }
 0xb69   :  { %v2870_v55 = vmax.f32 %v2866_v53, 0.0  ;;  %v4335_v56 = vpop.f32.mrb[32].mxu1  ;;  %v2994_v53 = vld [vmem:[%s6400_s3 + $0xe40] sm:$0xff] }
 0xb6a   :  { %v2869_v57 = vadd.f32 %v4335_v56, %v2865_v49  ;;  %v2852_v58 = vpop.f32.mrb[33].mxu1  ;;  %v4939_v60 = vpack.c.bf16 %v2994_v53, %v2993_v52  ;;  %v3353_v53 = vld [vmem:[%s6400_s3 + $0x1140] sm:$0xff] }
 0xb6b   :  { %v4897_v59 = vpack.c.bf16 %v2871_v54, %v2870_v55  ;;  %v2868_v61 = vadd.f32 %v2865_v49, %v2852_v58 }
 0xb6c   :  { %v2873_v63 = vmax.f32 %v2869_v57, 0.0 }
 0xb6d   :  { %v2872_v0 = vmax.f32 %v2868_v61, 0.0  ;;  %4898 = vmatpush3.bf16.msra.mxu0 %v4897_v59 }
 0xb6e   :  { %4899 = vmatprep.subr.bf16.mxu0 %v5090_v29  ;;  %v4907_v29 = vpack.c.bf16 %v3007_v4, %v3006_v3 }
 0xb6f   :  { %v4900_v2 = vpack.c.bf16 %v2873_v63, %v2872_v0  ;;  %v2995_v63 = vld [vmem:[%s6400_s3 + $0xe50] sm:$0xff]  ;;  %v2996_v0 = vld [vmem:[%s6400_s3 + $0xe60] sm:$0xff] }
 0xb71   :  { %4902 = vmatpush3.bf16.msk.msra.mxu0 %vm4901_vm5, %v4900_v2 }
 0xb72   :  { %4904 = vmatprep.subr.bf16.mxu0 %v4903_v1 }
 0xb74   :  { %4345 = vmatmul.mubr.msk.f32.vlgmr.msra.gmra.mrb[12].mxu0 %vm2879_vm7, %v2874_v5 }
 0xb75   :  { %4347 = vmatprep.mubr.msk.f32.mxu0 %vm5091_vm9, %v5092_v30  ;;  %4906 = vmatpush3.bf16.msra.mxu0 %v4903_v1 }
 0xb76   :  { %4908 = vmatprep.subr.bf16.mxu0 %v4907_v29 }
 0xb78   :  { %4348 = vmatmul.mubr.msk.f32.gmra.mrb[14].mxu0 %vm2879_vm7, %v2875_v10 }
 0xb79   :  { %4350 = vmatprep.mubr.msk.f32.mxu0 %vm5091_vm9, %v5092_v30  ;;  %4910 = vmatpush3.bf16.msra.mxu0 %v4907_v29  ;;  %v4943_v29 = vpack.c.bf16 %v2996_v0, %v2995_v63  ;;  %v3470_v63 = vld [vmem:[%s6400_s3 + $0x11b0] ss:$0 sm:$0xff] }
 0xb7a   :  { %4912 = vmatprep.subr.bf16.mxu0 %v4911_v11 }
 0xb7c   :  { %4351 = vmatmul.mubr.msk.f32.gmra.mrb[16].mxu0 %vm2879_vm7, %v2876_v14  ;;  %v4951_v14 = vpack.c.bf16 %v3000_v13, %v2999_v12 }
 0xb7d   :  { %4353 = vmatprep.mubr.msk.f32.mxu0 %vm5091_vm9, %v5092_v30  ;;  %4914 = vmatpush3.bf16.msra.mxu0 %v4911_v11  ;;  %v4947_v11 = vpack.c.bf16 %v2998_v7, %v2997_v6 }
 0xb7e   :  { %4916 = vmatprep.subr.bf16.mxu0 %v4915_v15 }
 0xb80   :  { %4354 = vmatmul.mubr.msk.f32.gmra.mrb[18].mxu0 %vm2879_vm7, %v2877_v18  ;;  %v3003_v18 = vld [vmem:[%s6400_s3 + $0xed0] sm:$0xf] }
 0xb81   :  { %4356 = vmatprep.mubr.msk.f32.mxu0 %vm5091_vm9, %v5092_v30  ;;  %4918 = vmatpush3.bf16.msra.mxu0 %v4915_v15  ;;  %v3017_v30 = vld [vmem:[%s6400_s3 + $0xfb0] sm:$0xff] }
 0xb82   :  { %4920 = vmatprep.subr.bf16.mxu0 %v4919_v19  ;;  %v4927_v25 = vpack.c.bf16 %v3017_v30, %v3016_v24  ;;  %v3001_v15 = vld [vmem:[%s6400_s3 + $0xeb0] sm:$0xff] }
 0xb83   :  { %v4955_v17 = vpack.c.bf16 %v3002_v16, %v3001_v15  ;;  %v3227_v30 = vld [vmem:[%s6400_s3 + $0x1010] sm:$0xff] }
 0xb84   :  { %4357 = vmatmul.mubr.msk.f32.gmra.mrb[20].mxu0 %vm2879_vm7, %v2878_v22  ;;  %v3226_v22 = vld [vmem:[%s6400_s3 + $0x1000] sm:$0xff] }
 0xb85   :  { %4922 = vmatpush3.bf16.msra.mxu0 %v4919_v19  ;;  %v3223_v19 = vld [vmem:[%s6400_s3 + $0xfd0] sm:$0xff]  ;;  %v4963_v24 = vpack.c.bf16 %v3226_v22, %v3225_v21 }
 0xb86   :  { %4924 = vmatprep.subr.bf16.mxu0 %v4923_v23 }
 0xb89   :  { %4926 = vmatpush3.bf16.msra.mxu0 %v4923_v23  ;;  %v4959_v23 = vpack.c.bf16 %v3224_v20, %v3223_v19 }
 0xb8a   :  { %4928 = vmatprep.subr.bf16.mxu0 %v4927_v25 }
 0xb8d   :  { %4930 = vmatpush3.bf16.msra.mxu0 %v4927_v25  ;;  %v3228_v25 = vld [vmem:[%s6400_s3 + $0x1020] sm:$0xff] }
 0xb8e   :  { %4387 = vmatprep.subr.msk.mxu0 %vm639_vm6, %v3018_v26 }
 0xb91   :  { %4388 = vmatpush3.msk.msra.mxu0 %vm639_vm6, %v3018_v26  ;;  %v4967_v26 = vpack.c.bf16 %v3228_v25, %v3227_v30 }
 0xb92   :  { %4932 = vmatprep.subr.bf16.mxu0 %v4931_v31 }
 0xc47   :  { %v2965_v32 = vpop.f32.mrb[12].mxu0 }
 0xc48   :  { %v4346_v33 = vpop.f32.mrb[13].mxu0  ;;  %v3023_v34 = vrot.slane %v2965_v32, 1  ;;  %v3238_v35 = vrot.slane %v2965_v32, 2  ;;  %v3361_v37 = vrot.slane %v2965_v32, 3 }
 0xc49   :  { %v3232_v33 = vld [vmem:[%s6400_s3 + $0x1060] sm:$0xff] }
 0xc4b   :  { %v6181_v36 = vpop.f32.mrb[14].mxu0 }
 0xc4c   :  { %v3024_v38 = vrot.slane %v6181_v36, 1  ;;  %v3239_v9 = vrot.slane %v6181_v36, 2  ;;  %v3362_v39 = vrot.slane %v6181_v36, 3  ;;  %v4349_v40 = vpop.f32.mrb[15].mxu0 }
 0xc4d   :  { %v3237_v40 = vld [vmem:[%s6400_s3 + $0x10b0] sm:$0xf] }
 0xc4e   :  { %v3025_v8 = vsel %vm33_vm3, %v3023_v34, %v3024_v38  ;;  %v6194_v43 = vsel %vm50_vm0, %v3238_v35, %v3239_v9  ;;  %v6197_v44 = vsel %vm2895_vm2, %v3361_v37, %v3362_v39  ;;  %v3233_v35 = vld [vmem:[%s6400_s3 + $0x1070] sm:$0xff] }
 0xc4f   :  { %v6199_v45 = vpop.f32.mrb[16].mxu0  ;;  %4389 = vmatprep.mubr.msk.f32.mxu0 %vm3030_vm1, %v3025_v8  ;;  %v3345_v8 = vld [vmem:[%s6400_s3 + $0x10c0] sm:$0xff] }
 0xc50   :  { %v3026_v46 = vrot.slane %v6199_v45, 1  ;;  %v3241_v47 = vrot.slane %v6199_v45, 2  ;;  %v3364_v48 = vrot.slane %v6199_v45, 3  ;;  %v4352_v49 = vpop.f32.mrb[17].mxu0 }
 0xc52   :  { %v3027_v51 = vsel %vm33_vm3, %v3024_v38, %v3026_v46  ;;  %v6213_v54 = vsel %vm50_vm0, %v3239_v9, %v3241_v47  ;;  %v6216_v55 = vsel %vm2895_vm2, %v3362_v39, %v3364_v48  ;;  %v3235_v38 = vld [vmem:[%s6400_s3 + $0x1090] sm:$0xff]  ;;  %v3236_v9 = vld [vmem:[%s6400_s3 + $0x10a0] sm:$0xff] }
 0xc53   :  { %v6218_v56 = vpop.f32.mrb[18].mxu0  ;;  %4390 = vmatmul.mubr.msk.f32.vlgmr.msra.gmra.mrb[22].mxu0 %vm3030_vm1, %v3027_v51  ;;  %v4983_v39 = vpack.c.bf16 %v3236_v9, %v3235_v38  ;;  %v3352_v51 = vld [vmem:[%s6400_s3 + $0x1130] sm:$0xff] }
 0xc54   :  { %v3028_v57 = vrot.slane %v6218_v56, 1  ;;  %v3243_v58 = vrot.slane %v6218_v56, 2  ;;  %v3366_v59 = vrot.slane %v6218_v56, 3  ;;  %4934 = vmatpush3.bf16.msra.mxu0 %v4931_v31  ;;  %v4355_v61 = vpop.f32.mrb[19].mxu0  ;;  %v4971_v31 = vpack.c.bf16 %v3230_v28, %v3229_v27 }
 0xc55   :  { %4936 = vmatprep.subr.bf16.mxu0 %v4935_v50  ;;  %v3358_v61 = vld [vmem:[%s6400_s3 + $0x1190] sm:$0xff] }
 0xc56   :  { %v3029_v62 = vsel %vm33_vm3, %v3026_v46, %v3028_v57  ;;  %v6234_v1 = vsel %vm50_vm0, %v3241_v47, %v3243_v58  ;;  %v6237_v2 = vsel %vm2895_vm2, %v3364_v48, %v3366_v59  ;;  %v3349_v47 = vld [vmem:[%s6400_s3 + $0x1100] sm:$0xff]  ;;  %v3350_v48 = vld [vmem:[%s6400_s3 + $0x1110] sm:$0xff] }
 0xc57   :  { %4392 = vmatprep.mubr.msk.f32.mxu0 %vm3030_vm1, %v3029_v62  ;;  %v2985_v3 = vpop.f32.mrb[20].mxu0  ;;  %v4995_v49 = vpack.c.bf16 %v3350_v48, %v3349_v47  ;;  %v3359_v62 = vld [vmem:[%s6400_s3 + $0x11a0] sm:$0xf] }
 0xc58   :  { %4938 = vmatpush3.bf16.msra.mxu0 %v4935_v50  ;;  %v3368_v4 = vrot.slane %v2985_v3, 3  ;;  %v4358_v5 = vpop.f32.mrb[21].mxu0  ;;  %v3351_v50 = vld [vmem:[%s6400_s3 + $0x1120] sm:$0xff] }
 0xc59   :  { %4393 = vmatmul.mubr.msk.f32.gmra.mrb[24].mxu0 %vm3030_vm1, %v3028_v57  ;;  %4940 = vmatprep.subr.bf16.mxu0 %v4939_v60  ;;  %v4999_v52 = vpack.c.bf16 %v3352_v51, %v3351_v50 }
 0xc5a   :  { %4425 = vmatprep.mubr.msk.f32.mxu0 %vm3030_vm1, %v2965_v32  ;;  %v6249_v10 = vsel %vm2895_vm2, %v3366_v59, %v3368_v4  ;;  %v3231_v32 = vld [vmem:[%s6400_s3 + $0x1050] sm:$0xff]  ;;  %v3357_v59 = vld [vmem:[%s6400_s3 + $0x1180] sm:$0xff] }
 0xc5b   :  { %v4975_v34 = vpack.c.bf16 %v3232_v33, %v3231_v32 }
 0xc5c   :  { %4942 = vmatpush3.bf16.msra.mxu0 %v4939_v60  ;;  %v5011_v60 = vpack.c.bf16 %v3358_v61, %v3357_v59 }
 0xc5d   :  { %4944 = vmatprep.subr.bf16.mxu0 %v4943_v29 }
 0xc60   :  { %4946 = vmatpush3.bf16.msra.mxu0 %v4943_v29 }
 0xc61   :  { %4948 = vmatprep.subr.bf16.mxu0 %v4947_v11 }
 0xc64   :  { %4950 = vmatpush3.bf16.msra.mxu0 %v4947_v11 }
 0xc65   :  { %4952 = vmatprep.subr.bf16.mxu0 %v4951_v14 }
 0xc68   :  { %4954 = vmatpush3.bf16.msra.mxu0 %v4951_v14 }
 0xc69   :  { %4956 = vmatprep.subr.bf16.mxu0 %v4955_v17 }
 0xc6c   :  { %4958 = vmatpush3.bf16.msra.mxu0 %v4955_v17 }
 0xc6d   :  { %4423 = vmatprep.subr.msk.mxu0 %vm639_vm6, %v3003_v18 }
 0xc70   :  { %4424 = vmatpush3.msk.msra.mxu0 %vm639_vm6, %v3003_v18 }
 0xc71   :  { %4426 = vmatmul.mubr.msk.f32.vlgmr.msra.gmra.mrb[22].mxu0 %vm3030_vm1, %v6181_v36  ;;  %4960 = vmatprep.subr.bf16.mxu0 %v4959_v23  ;;  %v3234_v36 = vld [vmem:[%s6400_s3 + $0x1080] sm:$0xff] }
 0xc72   :  { %4428 = vmatprep.mubr.msk.f32.mxu0 %vm3030_vm1, %v6199_v45  ;;  %4962 = vmatpush3.bf16.msra.mxu0 %v4959_v23  ;;  %v4979_v37 = vpack.c.bf16 %v3234_v36, %v3233_v35  ;;  %v4987_v45 = vpack.c.bf16 %v3346_v41, %v3345_v8 }
 0xc73   :  { %4964 = vmatprep.subr.bf16.mxu0 %v4963_v24 }
 0xc75   :  { %4429 = vmatmul.mubr.msk.f32.gmra.mrb[24].mxu0 %vm3030_vm1, %v6218_v56  ;;  %v3355_v56 = vld [vmem:[%s6400_s3 + $0x1160] sm:$0xff] }
 0xc76   :  { %4966 = vmatpush3.bf16.msra.mxu0 %v4963_v24  ;;  %4461 = vmatprep.mubr.msk.f32.mxu0 %vm3030_vm1, %v6194_v43  ;;  %v3348_v43 = vld [vmem:[%s6400_s3 + $0x10f0] sm:$0xff] }
 0xc77   :  { %4968 = vmatprep.subr.bf16.mxu0 %v4967_v26  ;;  %v4991_v46 = vpack.c.bf16 %v3348_v43, %v3347_v42 }
 0xc7a   :  { %4970 = vmatpush3.bf16.msra.mxu0 %v4967_v26 }
 0xc7b   :  { %4972 = vmatprep.subr.bf16.mxu0 %v4971_v31 }
 0xc7e   :  { %4974 = vmatpush3.bf16.msra.mxu0 %v4971_v31 }
 0xc7f   :  { %4976 = vmatprep.subr.bf16.mxu0 %v4975_v34 }
 0xc82   :  { %4978 = vmatpush3.bf16.msra.mxu0 %v4975_v34 }
 0xc83   :  { %4980 = vmatprep.subr.bf16.mxu0 %v4979_v37 }
 0xc86   :  { %4982 = vmatpush3.bf16.msra.mxu0 %v4979_v37 }
 0xc87   :  { %4984 = vmatprep.subr.bf16.mxu0 %v4983_v39 }
 0xc8a   :  { %4986 = vmatpush3.bf16.msra.mxu0 %v4983_v39 }
 0xc8b   :  { %4459 = vmatprep.subr.msk.mxu0 %vm639_vm6, %v3237_v40 }
 0xc8e   :  { %4460 = vmatpush3.msk.msra.mxu0 %vm639_vm6, %v3237_v40 }
 0xc8f   :  { %4462 = vmatmul.mubr.msk.f32.vlgmr.msra.gmra.mrb[22].mxu0 %vm3030_vm1, %v6213_v54  ;;  %4988 = vmatprep.subr.bf16.mxu0 %v4987_v45  ;;  %v3354_v54 = vld [vmem:[%s6400_s3 + $0x1150] sm:$0xff] }
 0xc90   :  { %4464 = vmatprep.mubr.msk.f32.mxu0 %vm3030_vm1, %v6234_v1  ;;  %4990 = vmatpush3.bf16.msra.mxu0 %v4987_v45  ;;  %v5003_v57 = vpack.c.bf16 %v3354_v54, %v3353_v53 }
 0xc91   :  { %4992 = vmatprep.subr.bf16.mxu0 %v4991_v46 }
 0xc93   :  { %4465 = vmatmul.mubr.msk.f32.gmra.mrb[24].mxu0 %vm3030_vm1, %v3243_v58 }
 0xc94   :  { %4994 = vmatpush3.bf16.msra.mxu0 %v4991_v46  ;;  %4497 = vmatprep.mubr.msk.f32.mxu0 %vm3030_vm1, %v6197_v44  ;;  %v3356_v44 = vld [vmem:[%s6400_s3 + $0x1170] sm:$0xff] }
 0xc95   :  { %4996 = vmatprep.subr.bf16.mxu0 %v4995_v49  ;;  %v5007_v58 = vpack.c.bf16 %v3356_v44, %v3355_v56 }
 0xc98   :  { %4998 = vmatpush3.bf16.msra.mxu0 %v4995_v49 }
 0xc99   :  { %5000 = vmatprep.subr.bf16.mxu0 %v4999_v52 }
 0xc9c   :  { %5002 = vmatpush3.bf16.msra.mxu0 %v4999_v52 }
 0xc9d   :  { %5004 = vmatprep.subr.bf16.mxu0 %v5003_v57 }
 0xca0   :  { %5006 = vmatpush3.bf16.msra.mxu0 %v5003_v57 }
 0xca1   :  { %5008 = vmatprep.subr.bf16.mxu0 %v5007_v58 }
 0xca4   :  { %5010 = vmatpush3.bf16.msra.mxu0 %v5007_v58 }
 0xca5   :  { %5012 = vmatprep.subr.bf16.mxu0 %v5011_v60 }
 0xca8   :  { %5014 = vmatpush3.bf16.msra.mxu0 %v5011_v60 }
 0xca9   :  { %4495 = vmatprep.subr.msk.mxu0 %vm639_vm6, %v3359_v62 }
 0xcac   :  { %4496 = vmatpush3.msk.msra.mxu0 %vm639_vm6, %v3359_v62 }
 0xcad   :  { %4498 = vmatmul.mubr.msk.f32.vlgmr.msra.gmra.mrb[22].mxu0 %vm3030_vm1, %v6216_v55 }
 0xcae   :  { %4500 = vmatprep.mubr.msk.f32.mxu0 %vm3030_vm1, %v6237_v2 }
 0xcb1   :  { %4501 = vmatmul.mubr.msk.f32.gmra.mrb[24].mxu0 %vm3030_vm1, %v6249_v10 }
 0xd80   :  { %v4499_v0 = vpop.f32.mrb[22].mxu0 }
 0xd81   :  { %v3472_v1 = vadd.f32 %v4499_v0, %v3470_v63  ;;  %v3447_v3 = vpop.f32.mrb[23].mxu0 }
 0xd82   :  { %v3471_v4 = vadd.f32 %v3470_v63, %v3447_v3 }
 0xd83   :  { %v3476_v5 = vmul.f32 0.5, %v3472_v1 }
 0xd84   :  { %v3475_v29 = vmul.f32 0.5, %v3471_v4  ;;  %v4502_v6 = vpop.f32.mrb[24].mxu0 }
 0xd85   :  { %5081 = vtanh.f32 %v3476_v5  ;;  %v3474_v7 = vadd.f32 %v4502_v6, %v3470_v63  ;;  %v3457_v55 = vpop.f32.mrb[25].mxu0 }
 0xd86   :  { %5083 = vtanh.f32 %v3475_v29  ;;  %v3473_v11 = vadd.f32 %v3470_v63, %v3457_v55 }
 0xd87   :  { %v3478_v2 = vmul.f32 0.5, %v3474_v7 }
 0xd88   :  { %v3477_v12 = vmul.f32 0.5, %v3473_v11 }
 0xd89   :  { %5085 = vtanh.f32 %v3478_v2 }
 0xd8a   :  { %5087 = vtanh.f32 %v3477_v12 }
 0xd8f   :  { %v5082_v10 = vpop.eup %5081 }
 0xd90   :  { %v5084_v13 = vpop.eup %5083  ;;  %v3484_v14 = vadd.f32 1.0, %v5082_v10 }
 0xd91   :  { %v3483_v15 = vadd.f32 1.0, %v5084_v13 }
 0xd92   :  { %v3488_v16 = vmul.f32 0.5, %v3484_v14 }
 0xd93   :  { %v5086_v17 = vpop.eup %5085  ;;  %v3487_v18 = vmul.f32 0.5, %v3483_v15 }
 0xd94   :  { %v5088_v19 = vpop.eup %5087  ;;  %3492 = vst [vmem:[%s6404_s4 + $0x8] sm:$0xff] %v3488_v16  ;;  %v3486_v20 = vadd.f32 1.0, %v5086_v17 }
 0xd95   :  { %3491 = vst [vmem:[%s6404_s4] sm:$0xff] %v3487_v18  ;;  %v3485_v21 = vadd.f32 1.0, %v5088_v19 }
 0xd96   :  { %v3490_v22 = vmul.f32 0.5, %v3486_v20 }
 0xd97   :  { %v3489_v23 = vmul.f32 0.5, %v3485_v21 }
 0xd98   :  { %3494 = vst [vmem:[%s6404_s4 + $0x18] sm:$0x3f] %v3490_v22 }
 0xd99   :  { %3493 = vst [vmem:[%s6404_s4 + $0x10] sm:$0xff] %v3489_v23 }

</bundles_post_ra>
